<compile_context>
chip_gen: v5e
topology: v5e:2x2
jax: 0.10.0
libtpu: 0.0.40
codegen_flags: <defaults>
</compile_context>

<pallas_src>
import jax
import jax.numpy as jnp
from jax import lax
from jax.experimental import pallas as pl
from jax.experimental.pallas import tpu as pltpu

# ---------------- configuration (small, consistent with the module) -------------
N = 2            # batch
C_IN = 4         # in_channels
C_OUT = 128      # out_channels (module default; also TPU lane width)
H = W = 16       # spatial
HW = H * W
M_ROWS = N * HW  # 512 rows, multiple of 8 (sublane tile) -> no padded rows in BN stats
RATES = (6, 12, 18)
MAXPAD = max(RATES)
K_RAW = (1 + 9 * len(RATES) + 1) * C_IN   # 29 taps * Cin = 116
K_PAD = 128                               # pad contraction dim to one full lane tile
BN_EPS = 1e-5


# ------------------------------- Pallas kernel -----------------------------------
def aspp_fused_kernel(a_ref, w_ref, g_ref, b_ref, o_ref):
    """Fused ASPP: one (M,128)@(128,Cout) GEMM + training-mode BatchNorm + ReLU.

    a_ref: (M, 128)      zero-padded im2col tap matrix (M = N*H*W)
    w_ref: (128, Cout)   projection-folded, zero-padded branch weights
    g_ref, b_ref: (1, Cout)  BatchNorm gamma / beta
    o_ref: (N, Cout, H*W)    NCHW-compatible output layout
    """
    a = a_ref[...]
    w = w_ref[...]

    # Single MXU GEMM — all five branches + the concat/1x1 projection.
    y = jnp.dot(a, w, preferred_element_type=jnp.float32)               # (M, Cout)

    # Batch-stat mean via a tiny (1,K)@(K,Cout) GEMM (exact by linearity of the conv):
    # avoids a second full reduction pass over y and any E[y^2]-mean^2 cancellation.
    inv_m = 1.0 / M_ROWS
    col_mean_a = jnp.sum(a, axis=0, keepdims=True) * inv_m               # (1, K)
    mean = jnp.dot(col_mean_a, w, preferred_element_type=jnp.float32)    # (1, Cout)

    diff = y - mean
    var = jnp.sum(diff * diff, axis=0, keepdims=True) * inv_m            # biased variance

    # BN folded into per-column scale (+ beta); ReLU fused.
    scale = g_ref[...] * lax.rsqrt(var + BN_EPS)                          # (1, Cout)
    out = jnp.maximum(diff * scale + b_ref[...], 0.0)                     # (M, Cout)

    # Emit NCHW-compatible layout: per-batch (HW,Cout) -> (Cout,HW) XLU transpose,
    # so the wrapper needs only a free (metadata) reshape, no XLA transpose kernel.
    for i in range(N):
        o_ref[i] = jnp.transpose(out[i * HW:(i + 1) * HW, :], (1, 0))


# ------------------------- wrapper-side layout plumbing ---------------------------
def _im2col_taps(x_nchw):
    """Lane-dense tap matrix (N*H*W, K_PAD).  Column blocks (each Cin wide), in order:
    [1x1 center] + [27 dilated taps: rate-major, ky, kx] + [global-avg pooled] + [zeros pad].
    """
    x = jnp.transpose(x_nchw, (0, 2, 3, 1))                               # NHWC
    n, h, w, cin = x.shape
    xp = jnp.pad(x, ((0, 0), (MAXPAD, MAXPAD), (MAXPAD, MAXPAD), (0, 0)))

    taps = [xp[:, MAXPAD:MAXPAD + h, MAXPAD:MAXPAD + w, :]]               # 1x1 branch
    for d in RATES:                                                        # dilated 3x3 branches
        for ky in range(3):
            for kx in range(3):
                oy = MAXPAD - d + ky * d
                ox = MAXPAD - d + kx * d
                taps.append(xp[:, oy:oy + h, ox:ox + w, :])
    # Global-avg-pool branch; bilinear upsample from 1x1 (align_corners=False)
    # is exactly a constant broadcast over H x W.
    pooled = jnp.mean(x, axis=(1, 2), keepdims=True)                      # (N,1,1,Cin)
    taps.append(jnp.broadcast_to(pooled, (n, h, w, cin)))

    a = jnp.concatenate(taps, axis=-1).reshape(n * h * w, K_RAW)          # (M, 116)
    # Zero-pad K 116 -> 128 (exact): one clean 128-deep MXU contraction pass.
    return jnp.pad(a, ((0, 0), (0, K_PAD - K_RAW)))                       # (M, 128)


def _fold_weights(params):
    """Fold the concat/1x1 projection wc into the branch weights, stack them in the
    same order as the im2col columns, zero-pad to (K_PAD, Cout)."""
    wc = params["wc"]                                                     # (5, Cout, Cout)
    cout = wc.shape[-1]

    w1f = params["w1"] @ wc[0]                                            # (Cin, Cout)

    def fold3(wk, wci):                                                   # (3,3,Cin,Cout)->(9*Cin,Cout)
        return jnp.einsum("yxio,od->yxid", wk, wci).reshape(-1, cout)

    w2f = fold3(params["w2"], wc[1])
    w3f = fold3(params["w3"], wc[2])
    w4f = fold3(params["w4"], wc[3])
    w5f = params["w5"] @ wc[4]                                            # (Cin, Cout)

    wf = jnp.concatenate([w1f, w2f, w3f, w4f, w5f], axis=0)               # (116, Cout)
    return jnp.pad(wf, ((0, K_PAD - K_RAW), (0, 0)))                      # (128, Cout)


def aspp_forward(x_nchw, params):
    n, cin, h, w = x_nchw.shape
    cout = params["w1"].shape[1]

    a = _im2col_taps(x_nchw)                                              # (M, 128)
    wf = _fold_weights(params)                                            # (128, Cout)

    vmem = pltpu.MemorySpace.VMEM
    out3d = pl.pallas_call(
        aspp_fused_kernel,
        out_shape=jax.ShapeDtypeStruct((n, cout, h * w), jnp.float32),
        in_specs=[
            pl.BlockSpec(memory_space=vmem),   # A     (512,128) = 256 KiB
            pl.BlockSpec(memory_space=vmem),   # Wf    (128,128) =  64 KiB
            pl.BlockSpec(memory_space=vmem),   # gamma (1,128)
            pl.BlockSpec(memory_space=vmem),   # beta  (1,128)
        ],
        out_specs=pl.BlockSpec(memory_space=vmem),   # (2,128,256) = 256 KiB
        compiler_params=pltpu.CompilerParams(
            # Let XLA fuse the im2col / weight-fold producers into the pallas
            # operands instead of materializing them in HBM and re-reading.
            allow_input_fusion=[True, True, False, False],
        ),
    )(a, wf, params["gamma"], params["beta"])

    # (N, Cout, H*W) -> (N, Cout, H, W): row-major compatible, free reshape (no transpose).
    return out3d.reshape(n, cout, h, w)


# --------------------------- pure-JAX reference ----------------------------------
def aspp_reference(x_nchw, params):
    x = jnp.transpose(x_nchw, (0, 2, 3, 1))                               # NHWC
    w1, w2, w3, w4, w5, wc = (params[k] for k in ("w1", "w2", "w3", "w4", "w5", "wc"))

    def dconv(xx, ww, d):
        return lax.conv_general_dilated(
            xx, ww, window_strides=(1, 1), padding=((d, d), (d, d)),
            rhs_dilation=(d, d), dimension_numbers=("NHWC", "HWIO", "NHWC"))

    b1 = jnp.einsum("nhwc,cd->nhwd", x, w1)
    b2 = dconv(x, w2, RATES[0])
    b3 = dconv(x, w3, RATES[1])
    b4 = dconv(x, w4, RATES[2])
    pooled = jnp.mean(x, axis=(1, 2))                                     # (N, Cin)
    b5 = jnp.einsum("nc,cd->nd", pooled, w5)[:, None, None, :]
    b5 = jnp.broadcast_to(b5, b1.shape)                                   # bilinear from 1x1 = broadcast
    cat = jnp.concatenate([b1, b2, b3, b4, b5], axis=-1)                  # (N,H,W,5*Cout)
    y = jnp.einsum("nhwk,kd->nhwd", cat, wc.reshape(5 * C_OUT, C_OUT))
    mean = jnp.mean(y, axis=(0, 1, 2))
    var = jnp.mean((y - mean) ** 2, axis=(0, 1, 2))
    y = (y - mean) / jnp.sqrt(var + BN_EPS)
    y = y * params["gamma"][0] + params["beta"][0]
    y = jnp.maximum(y, 0.0)
    return jnp.transpose(y, (0, 3, 1, 2))


# ------------------------------------ main ----------------------------------------
if __name__ == "__main__":
    key = jax.random.PRNGKey(0)
    kx, k1, k2, k3, k4, k5, kc = jax.random.split(key, 7)

    x = jax.random.normal(kx, (N, C_IN, H, W), dtype=jnp.float32)

    scale = 0.1
    params = {
        "w1": scale * jax.random.normal(k1, (C_IN, C_OUT), jnp.float32),
        "w2": scale * jax.random.normal(k2, (3, 3, C_IN, C_OUT), jnp.float32),
        "w3": scale * jax.random.normal(k3, (3, 3, C_IN, C_OUT), jnp.float32),
        "w4": scale * jax.random.normal(k4, (3, 3, C_IN, C_OUT), jnp.float32),
        "w5": scale * jax.random.normal(k5, (C_IN, C_OUT), jnp.float32),
        # conv1x1 weight (5*Cout -> Cout), split per concatenated branch
        "wc": scale * jax.random.normal(kc, (5, C_OUT, C_OUT), jnp.float32),
        "gamma": jnp.ones((1, C_OUT), jnp.float32),   # BatchNorm default weight
        "beta": jnp.zeros((1, C_OUT), jnp.float32),   # BatchNorm default bias
    }

    out = jax.jit(aspp_forward)(x, params)
    out = jax.block_until_ready(out)

    ref = jax.block_until_ready(aspp_reference(x, params))
    assert out.shape == (N, C_OUT, H, W), out.shape
    assert jnp.allclose(out, ref, atol=1e-3, rtol=1e-3), float(jnp.max(jnp.abs(out - ref)))

    print("KERNEL_OK")
</pallas_src>

<mosaic_0001>
module attributes {stable_mosaic.version = 11 : i64} {
  func.func @aspp_fused_kernel(%arg0: memref<512x128xf32, #tpu.memory_space<vmem>>, %arg1: memref<128x128xf32, #tpu.memory_space<vmem>>, %arg2: memref<1x128xf32, #tpu.memory_space<vmem>>, %arg3: memref<1x128xf32, #tpu.memory_space<vmem>>, %arg4: memref<2x128x256xf32, #tpu.memory_space<vmem>>) attributes {dimension_semantics = [], scalar_prefetch = 0 : i64, scratch_operands = 0 : i64, tpu.core_type = #tpu.core_type<tc>} {
    %c0 = arith.constant 0 : index
    %c0_0 = arith.constant 0 : index
    %0 = vector.load %arg0[%c0, %c0_0] : memref<512x128xf32, #tpu.memory_space<vmem>>, vector<512x128xf32>
    %c0_1 = arith.constant 0 : index
    %c0_2 = arith.constant 0 : index
    %1 = vector.load %arg1[%c0_1, %c0_2] : memref<128x128xf32, #tpu.memory_space<vmem>>, vector<128x128xf32>
    %cst = arith.constant dense<0.000000e+00> : vector<512x128xf32>
    %2 = tpu.matmul %0, %1, %cst {dimension_numbers = #tpu.dot_dimension_numbers<[1], [0], [0], [1], [0, 0, 1, 1], [], []>} : vector<512x128xf32>, vector<128x128xf32>, vector<512x128xf32> -> vector<512x128xf32>
    %cst_3 = arith.constant dense<0.000000e+00> : vector<128xf32>
    %3 = vector.multi_reduction <add>, %0, %cst_3 [0] : vector<512x128xf32> to vector<128xf32>
    %4 = vector.shape_cast %3 : vector<128xf32> to vector<1x128xf32>
    %cst_4 = arith.constant 0.001953125 : f32
    %5 = vector.broadcast %cst_4 : f32 to vector<1x128xf32>
    %6 = arith.mulf %4, %5 : vector<1x128xf32>
    %cst_5 = arith.constant dense<0.000000e+00> : vector<1x128xf32>
    %7 = tpu.matmul %6, %1, %cst_5 {dimension_numbers = #tpu.dot_dimension_numbers<[1], [0], [0], [1], [0, 0, 1, 1], [], []>} : vector<1x128xf32>, vector<128x128xf32>, vector<1x128xf32> -> vector<1x128xf32>
    %8 = vector.broadcast %7 : vector<1x128xf32> to vector<512x128xf32>
    %9 = arith.subf %2, %8 : vector<512x128xf32>
    %10 = arith.mulf %9, %9 : vector<512x128xf32>
    %cst_6 = arith.constant dense<0.000000e+00> : vector<128xf32>
    %11 = vector.multi_reduction <add>, %10, %cst_6 [0] : vector<512x128xf32> to vector<128xf32>
    %12 = vector.shape_cast %11 : vector<128xf32> to vector<1x128xf32>
    %cst_7 = arith.constant 0.001953125 : f32
    %13 = vector.broadcast %cst_7 : f32 to vector<1x128xf32>
    %14 = arith.mulf %12, %13 : vector<1x128xf32>
    %c0_8 = arith.constant 0 : index
    %c0_9 = arith.constant 0 : index
    %15 = vector.load %arg2[%c0_8, %c0_9] : memref<1x128xf32, #tpu.memory_space<vmem>>, vector<1x128xf32>
    %cst_10 = arith.constant 9.99999974E-6 : f32
    %16 = vector.broadcast %cst_10 : f32 to vector<1x128xf32>
    %17 = arith.addf %14, %16 : vector<1x128xf32>
    %18 = math.rsqrt %17 : vector<1x128xf32>
    %19 = arith.mulf %15, %18 : vector<1x128xf32>
    %20 = vector.broadcast %19 : vector<1x128xf32> to vector<512x128xf32>
    %21 = arith.mulf %9, %20 : vector<512x128xf32>
    %c0_11 = arith.constant 0 : index
    %c0_12 = arith.constant 0 : index
    %22 = vector.load %arg3[%c0_11, %c0_12] : memref<1x128xf32, #tpu.memory_space<vmem>>, vector<1x128xf32>
    %23 = vector.broadcast %22 : vector<1x128xf32> to vector<512x128xf32>
    %24 = arith.addf %21, %23 : vector<512x128xf32>
    %cst_13 = arith.constant 0.000000e+00 : f32
    %25 = vector.broadcast %cst_13 : f32 to vector<512x128xf32>
    %26 = arith.maximumf %24, %25 : vector<512x128xf32>
    %27 = vector.extract_strided_slice %26 {offsets = [0, 0], sizes = [256, 128], strides = [1, 1]} : vector<512x128xf32> to vector<256x128xf32>
    %28 = tpu.transpose %27, [1, 0] : vector<256x128xf32> -> vector<128x256xf32>
    %c0_14 = arith.constant 0 : index
    %c0_15 = arith.constant 0 : index
    %c0_16 = arith.constant 0 : index
    %29 = vector.load %arg4[%c0_14, %c0_15, %c0_16] : memref<2x128x256xf32, #tpu.memory_space<vmem>>, vector<1x128x256xf32>
    %30 = vector.shape_cast %29 : vector<1x128x256xf32> to vector<128x256xf32>
    %31 = vector.shape_cast %28 : vector<128x256xf32> to vector<1x128x256xf32>
    tpu.vector_store %arg4[%c0_14, %c0_15, %c0_16], %31 {strides = array<i32>} : memref<2x128x256xf32, #tpu.memory_space<vmem>>, vector<1x128x256xf32>,
    %32 = vector.extract_strided_slice %26 {offsets = [256, 0], sizes = [256, 128], strides = [1, 1]} : vector<512x128xf32> to vector<256x128xf32>
    %33 = tpu.transpose %32, [1, 0] : vector<256x128xf32> -> vector<128x256xf32>
    %c1 = arith.constant 1 : index
    %c0_17 = arith.constant 0 : index
    %c0_18 = arith.constant 0 : index
    %34 = vector.load %arg4[%c1, %c0_17, %c0_18] : memref<2x128x256xf32, #tpu.memory_space<vmem>>, vector<1x128x256xf32>
    %35 = vector.shape_cast %34 : vector<1x128x256xf32> to vector<128x256xf32>
    %36 = vector.shape_cast %33 : vector<128x256xf32> to vector<1x128x256xf32>
    tpu.vector_store %arg4[%c1, %c0_17, %c0_18], %36 {strides = array<i32>} : memref<2x128x256xf32, #tpu.memory_space<vmem>>, vector<1x128x256xf32>,
    return
  }
}

</mosaic_0001>

<bundles_post_ra>
// kernel: aspp_forward.2
= control target key start
LH: loop header
LB: loop body
LE: loop exit
PB: predicated region body
PF: predicated region fallthrough
CT: control target
= control target key end

     0   :  { %s3736_s0 = inlined_call_operand.vmem [shape: f32[1,128], index: 0, kind: input, shape index: {}]   ;;  %s3737_s1 = inlined_call_operand.vmem [shape: f32[1,128], index: 1, kind: input, shape index: {}]   ;;  %s3738_s2 = inlined_call_operand.vmem [shape: f32[512,116], index: 2, kind: input, shape index: {}]   ;;  %s3739_s3 = inlined_call_operand.<no memory space> [shape: f32[], index: 3, kind: input, shape index: {}]   ;;  %s3740_s4 = inlined_call_operand.vmem [shape: f32[116,128], index: 4, kind: input, shape index: {}]   ;;  %s3741_s5 = inlined_call_operand.vmem [shape: f32[2,128,256], index: 5, kind: output, shape index: {}]  }
   0x1   :  { %v2069_v0 = vstv %s3739_s3 }
   0x2   :  { %969 = vmatpush.msra.mxu0 %v2069_v0  ;;  %1985 = vmatpush.msra.mxu1 %v2069_v0  ;;  %v21_v1 = vlaneseq  ;;  %v1952_v4 = vld [vmem:[%s3740_s4 + $0x70] sm:$0xff]  ;;  %v20_v6 = vld [vmem:[%s3738_s2] sm:$0xff]  ;;  %v1876_v8 = vld [vmem:[%s3738_s2 + $0x8] sm:$0xff] }
   0x3   :  { %1986 = vmatpush.msra.mxu2 %v2069_v0  ;;  %1987 = vmatpush.msra.mxu3 %v2069_v0  ;;  %v1877_v9 = vld [vmem:[%s3738_s2 + $0x10] sm:$0xff]  ;;  %v2101_v11 = vld [vmem:[%s3740_s4 + $0x68] sm:$0xff]  ;;  %v1878_v14 = vld [vmem:[%s3738_s2 + $0x18] sm:$0xff] }
   0x4   :  { %v2075_v2 = vand.u32 127, %v21_v1  ;;  %v877_v3 = vshrl.u32 %v21_v1, 7  ;;  %v2125_v16 = vld [vmem:[%s3740_s4 + $0x60] sm:$0xff]  ;;  %v2143_v20 = vld [vmem:[%s3740_s4 + $0x58] sm:$0xff]  ;;  %v1880_v21 = vld [vmem:[%s3738_s2 + $0x28] sm:$0xff] }
   0x5   :  { %v1879_v18 = vld [vmem:[%s3738_s2 + $0x20] sm:$0xff]  ;;  %v2161_v24 = vld [vmem:[%s3740_s4 + $0x50] sm:$0xff]  ;;  %v2178_v27 = vld [vmem:[%s3740_s4 + $0x48] sm:$0xff] }
   0x6   :  { %vm24_vm0 = vcmp.lt.s32.totalorder %v2075_v2, 116  ;;  %v878_v5 = vadd.s32 112, %v877_v3  ;;  %v1881_v25 = vld [vmem:[%s3738_s2 + $0x30] sm:$0xff]  ;;  %v1882_v29 = vld [vmem:[%s3738_s2 + $0x38] sm:$0xff]  ;;  %v2196_v31 = vld [vmem:[%s3740_s4 + $0x40] sm:$0xff] }
   0x7   :  { %v2087_v7 = vsel %vm24_vm0, %v20_v6, %v2069_v0  ;;  %v2106_v12 = vsel %vm24_vm0, %v1876_v8, %v2069_v0  ;;  %v2111_v13 = vsel %vm24_vm0, %v1877_v9, %v2069_v0  ;;  %v2130_v17 = vsel %vm24_vm0, %v1878_v14, %v2069_v0  ;;  %v1883_v33 = vld [vmem:[%s3738_s2 + $0x40] sm:$0xff]  ;;  %v2214_v35 = vld [vmem:[%s3740_s4 + $0x38] sm:$0xff]  ;;  %v1884_v37 = vld [vmem:[%s3738_s2 + $0x48] sm:$0xff] }
   0x8   :  { %vm879_vm1 = vcmp.lt.s32.totalorder %v878_v5, 116  ;;  %v1178_v15 = vadd.f32 %v2106_v12, %v2087_v7  ;;  %v2154_v23 = vsel %vm24_vm0, %v1879_v18, %v2069_v0  ;;  %v2171_v26 = vsel %vm24_vm0, %v1880_v21, %v2069_v0  ;;  %v2232_v39 = vld [vmem:[%s3740_s4 + $0x30] sm:$0xff]  ;;  %v2250_v43 = vld [vmem:[%s3740_s4 + $0x28] sm:$0xff]  ;;  %v1886_v45 = vld [vmem:[%s3738_s2 + $0x58] sm:$0xff] }
   0x9   :  { %v2096_v10 = vsel %vm879_vm1, %v1952_v4, %v2069_v0  ;;  %v2189_v30 = vsel %vm24_vm0, %v1881_v25, %v2069_v0  ;;  %v2207_v34 = vsel %vm24_vm0, %v1882_v29, %v2069_v0  ;;  %v2225_v38 = vsel %vm24_vm0, %v1883_v33, %v2069_v0  ;;  %v1885_v41 = vld [vmem:[%s3738_s2 + $0x50] sm:$0xff]  ;;  %v2268_v47 = vld [vmem:[%s3740_s4 + $0x20] sm:$0xff]  ;;  %v2286_v51 = vld [vmem:[%s3740_s4 + $0x18] sm:$0xff] }
   0xa   :  { %970 = vmatpush.msra.mxu0 %v2096_v10  ;;  %1988 = vmatpush.msra.mxu1 %v2096_v10  ;;  %v1179_v19 = vadd.f32 %v1178_v15, %v2111_v13  ;;  %v2243_v42 = vsel %vm24_vm0, %v1884_v37, %v2069_v0  ;;  %v2261_v46 = vsel %vm24_vm0, %v1885_v41, %v2069_v0  ;;  %v1887_v49 = vld [vmem:[%s3738_s2 + $0x60] sm:$0xff]  ;;  %v1888_v53 = vld [vmem:[%s3738_s2 + $0x68] sm:$0xff]  ;;  %v2304_v55 = vld [vmem:[%s3740_s4 + $0x10] sm:$0xff] }
   0xb   :  { %1989 = vmatpush.msra.mxu2 %v2096_v10  ;;  %1990 = vmatpush.msra.mxu3 %v2096_v10  ;;  %v2279_v50 = vsel %vm24_vm0, %v1886_v45, %v2069_v0  ;;  %v2297_v54 = vsel %vm24_vm0, %v1887_v49, %v2069_v0  ;;  %v1889_v57 = vld [vmem:[%s3738_s2 + $0x70] sm:$0xff]  ;;  %v2315_v58 = vsel %vm24_vm0, %v1888_v53, %v2069_v0  ;;  %v2322_v59 = vld [vmem:[%s3740_s4 + $0x8] sm:$0xff]  ;;  %v1890_v61 = vld [vmem:[%s3738_s2 + $0x78] sm:$0xff] }
   0xc   :  { %971 = vmatpush.msra.mxu0 %v2101_v11  ;;  %1991 = vmatpush.msra.mxu1 %v2101_v11  ;;  %v1180_v22 = vadd.f32 %v1179_v19, %v2130_v17  ;;  %v1891_v62 = vld [vmem:[%s3738_s2 + $0x80] sm:$0xff]  ;;  %v2336_v63 = vsel %vm24_vm0, %v1889_v57, %v2069_v0  ;;  %v1905_v3 = vld [vmem:[%s3738_s2 + $0xf0] sm:$0xff]  ;;  %v1922_v4 = vld [vmem:[%s3738_s2 + $0x178] sm:$0xff]  ;;  %v2357_v6 = vsel %vm24_vm0, %v1890_v61, %v2069_v0 }
   0xd   :  { %1992 = vmatpush.msra.mxu2 %v2101_v11  ;;  %1993 = vmatpush.msra.mxu3 %v2101_v11  ;;  %v2343_v1 = vld [vmem:[%s3740_s4] sm:$0xff]  ;;  %v200_v8 = vsel %vm24_vm0, %v1891_v62, %v2069_v0  ;;  %v1892_v9 = vld [vmem:[%s3738_s2 + $0x88] sm:$0xff]  ;;  %v2373_v15 = vsel %vm24_vm0, %v1905_v3, %v2069_v0  ;;  %v2378_v18 = vsel %vm24_vm0, %v1922_v4, %v2069_v0  ;;  %v1893_v19 = vld [vmem:[%s3738_s2 + $0x90] sm:$0xff] }
   0xe   :  { %972 = vmatpush.msra.mxu0 %v2125_v16  ;;  %1994 = vmatpush.msra.mxu1 %v2125_v16  ;;  %v1181_v28 = vadd.f32 %v1180_v22, %v2154_v23  ;;  %v211_v22 = vsel %vm24_vm0, %v1892_v9, %v2069_v0  ;;  %v1894_v25 = vld [vmem:[%s3738_s2 + $0x98] sm:$0xff]  ;;  %v1895_v33 = vld [vmem:[%s3738_s2 + $0xa0] sm:$0xff]  ;;  %v1924_v57 = vld [vmem:[%s3738_s2 + $0x188] sm:$0xff] }
   0xf   :  { %1995 = vmatpush.msra.mxu2 %v2125_v16  ;;  %1996 = vmatpush.msra.mxu3 %v2125_v16  ;;  %v1906_v29 = vld [vmem:[%s3738_s2 + $0xf8] sm:$0xff]  ;;  %v233_v37 = vsel %vm24_vm0, %v1894_v25, %v2069_v0  ;;  %v1900_v62 = vld [vmem:[%s3738_s2 + $0xc8] sm:$0xff]  ;;  %v1903_v25 = vld [vmem:[%s3738_s2 + $0xe0] sm:$0xff] }
  0x10   :  { %973 = vmatpush.msra.mxu0 %v2143_v20  ;;  %1997 = vmatpush.msra.mxu1 %v2143_v20  ;;  %v1182_v32 = vadd.f32 %v1181_v28, %v2171_v26 }
  0x11   :  { %1998 = vmatpush.msra.mxu2 %v2143_v20  ;;  %1999 = vmatpush.msra.mxu3 %v2143_v20 }
  0x12   :  { %974 = vmatpush.msra.mxu0 %v2161_v24  ;;  %2000 = vmatpush.msra.mxu1 %v2161_v24  ;;  %v1183_v36 = vadd.f32 %v1182_v32, %v2189_v30  ;;  %v1923_v32 = vld [vmem:[%s3738_s2 + $0x180] sm:$0xff] }
  0x13   :  { %2001 = vmatpush.msra.mxu2 %v2161_v24  ;;  %2002 = vmatpush.msra.mxu3 %v2161_v24  ;;  %v2423_v45 = vsel %vm24_vm0, %v1923_v32, %v2069_v0 }
  0x14   :  { %975 = vmatpush.msra.mxu0 %v2178_v27  ;;  %2003 = vmatpush.msra.mxu1 %v2178_v27  ;;  %v1184_v40 = vadd.f32 %v1183_v36, %v2207_v34 }
  0x15   :  { %2004 = vmatpush.msra.mxu2 %v2178_v27  ;;  %2005 = vmatpush.msra.mxu3 %v2178_v27 }
  0x16   :  { %976 = vmatpush.msra.mxu0 %v2196_v31  ;;  %2006 = vmatpush.msra.mxu1 %v2196_v31  ;;  %v1185_v44 = vadd.f32 %v1184_v40, %v2225_v38  ;;  %v1896_v40 = vld [vmem:[%s3738_s2 + $0xa8] sm:$0xff] }
  0x17   :  { %2007 = vmatpush.msra.mxu2 %v2196_v31  ;;  %2008 = vmatpush.msra.mxu3 %v2196_v31 }
  0x18   :  { %977 = vmatpush.msra.mxu0 %v2214_v35  ;;  %2009 = vmatpush.msra.mxu1 %v2214_v35  ;;  %v1186_v48 = vadd.f32 %v1185_v44, %v2243_v42  ;;  %v2418_v44 = vsel %vm24_vm0, %v1906_v29, %v2069_v0 }
  0x19   :  { %2010 = vmatpush.msra.mxu2 %v2214_v35  ;;  %2011 = vmatpush.msra.mxu3 %v2214_v35 }
  0x1a   :  { %978 = vmatpush.msra.mxu0 %v2232_v39  ;;  %2012 = vmatpush.msra.mxu1 %v2232_v39  ;;  %v1187_v52 = vadd.f32 %v1186_v48, %v2261_v46  ;;  %v1897_v48 = vld [vmem:[%s3738_s2 + $0xb0] sm:$0xff] }
  0x1b   :  { %2013 = vmatpush.msra.mxu2 %v2232_v39  ;;  %2014 = vmatpush.msra.mxu3 %v2232_v39 }
  0x1c   :  { %979 = vmatpush.msra.mxu0 %v2250_v43  ;;  %2015 = vmatpush.msra.mxu1 %v2250_v43  ;;  %v1188_v56 = vadd.f32 %v1187_v52, %v2279_v50  ;;  %v2438_v52 = vsel %vm24_vm0, %v1896_v40, %v2069_v0 }
  0x1d   :  { %2016 = vmatpush.msra.mxu2 %v2250_v43  ;;  %2017 = vmatpush.msra.mxu3 %v2250_v43 }
  0x1e   :  { %980 = vmatpush.msra.mxu0 %v2268_v47  ;;  %2018 = vmatpush.msra.mxu1 %v2268_v47  ;;  %v1189_v60 = vadd.f32 %v1188_v56, %v2297_v54  ;;  %v1907_v56 = vld [vmem:[%s3738_s2 + $0x100] sm:$0xff] }
  0x1f   :  { %2019 = vmatpush.msra.mxu2 %v2268_v47  ;;  %2020 = vmatpush.msra.mxu3 %v2268_v47  ;;  %v376_v4 = vsel %vm24_vm0, %v1907_v56, %v2069_v0 }
  0x20   :  { %981 = vmatpush.msra.mxu0 %v2286_v51  ;;  %2021 = vmatpush.msra.mxu1 %v2286_v51  ;;  %v1190_v5 = vadd.f32 %v1189_v60, %v2315_v58  ;;  %v1899_v60 = vld [vmem:[%s3738_s2 + $0xc0] sm:$0xff] }
  0x21   :  { %2022 = vmatpush.msra.mxu2 %v2286_v51  ;;  %2023 = vmatpush.msra.mxu3 %v2286_v51 }
  0x22   :  { %982 = vmatpush.msra.mxu0 %v2304_v55  ;;  %2024 = vmatpush.msra.mxu1 %v2304_v55  ;;  %v1191_v14 = vadd.f32 %v1190_v5, %v2336_v63  ;;  %v2478_v5 = vsel %vm24_vm0, %v1924_v57, %v2069_v0 }
  0x23   :  { %2025 = vmatpush.msra.mxu2 %v2304_v55  ;;  %2026 = vmatpush.msra.mxu3 %v2304_v55 }
  0x24   :  { %983 = vmatpush.msra.mxu0 %v2322_v59  ;;  %2027 = vmatpush.msra.mxu1 %v2322_v59  ;;  %v1192_v21 = vadd.f32 %v1191_v14, %v2357_v6  ;;  %v2494_v14 = vsel %vm24_vm0, %v1900_v62, %v2069_v0 }
  0x25   :  { %2028 = vmatpush.msra.mxu2 %v2322_v59  ;;  %2029 = vmatpush.msra.mxu3 %v2322_v59 }
  0x26   :  { %984 = vmatpush.msra.mxu0 %v2343_v1  ;;  %2030 = vmatpush.msra.mxu1 %v2343_v1  ;;  %v1193_v28 = vadd.f32 %v1192_v21, %v200_v8  ;;  %v1908_v21 = vld [vmem:[%s3738_s2 + $0x108] sm:$0xff] }
  0x27   :  { %2031 = vmatpush.msra.mxu2 %v2343_v1  ;;  %2032 = vmatpush.msra.mxu3 %v2343_v1  ;;  %v387_v32 = vsel %vm24_vm0, %v1908_v21, %v2069_v0  ;;  %v1917_v21 = vld [vmem:[%s3738_s2 + $0x150] sm:$0xff] }
  0x28   :  { %985 = vmatmul.f32.vlgmr.msra.gmra.mxu0 %v2087_v7  ;;  %1033 = vmatmul.f32.vlgmr.msra.gmra.mxu1 %v200_v8  ;;  %v222_v7 = vsel %vm24_vm0, %v1893_v19, %v2069_v0  ;;  %v1194_v36 = vadd.f32 %v1193_v28, %v211_v22  ;;  %v1901_v8 = vld [vmem:[%s3738_s2 + $0xd0] sm:$0xff] }
  0x29   :  { %1075 = vmatmul.f32.vlgmr.msra.gmra.mxu2 %v2373_v15  ;;  %1126 = vmatmul.f32.vlgmr.msra.gmra.mxu3 %v2378_v18 }
  0x2a   :  { %1248 = vmatpush.msrb.mxu1 %v2069_v0  ;;  %v1195_v41 = vadd.f32 %v1194_v36, %v222_v7 }
  0x2c   :  { %1249 = vmatpush.msrb.mxu1 %v2096_v10  ;;  %v2429_v10 = vsel %vm24_vm0, %v1895_v33, %v2069_v0  ;;  %v1196_v49 = vadd.f32 %v1195_v41, %v233_v37  ;;  %v1909_v41 = vld [vmem:[%s3738_s2 + $0x110] sm:$0xff] }
  0x2e   :  { %1250 = vmatpush.msrb.mxu1 %v2101_v11  ;;  %v1898_v11 = vld [vmem:[%s3738_s2 + $0xb8] sm:$0xff]  ;;  %v1197_v53 = vadd.f32 %v1196_v49, %v2429_v10  ;;  %v398_v49 = vsel %vm24_vm0, %v1909_v41, %v2069_v0 }
  0x30   :  { %988 = vmatmul.f32.gmra.mxu0 %v2106_v12  ;;  %1036 = vmatmul.f32.gmra.mxu1 %v211_v22  ;;  %v2450_v12 = vsel %vm24_vm0, %v1897_v48, %v2069_v0  ;;  %v1198_v61 = vadd.f32 %v1197_v53, %v2438_v52  ;;  %v1925_v22 = vld [vmem:[%s3738_s2 + $0x190] sm:$0xff]  ;;  %v1912_v53 = vld [vmem:[%s3738_s2 + $0x128] sm:$0xff] }
  0x31   :  { %1078 = vmatmul.f32.gmra.mxu2 %v2418_v44  ;;  %1129 = vmatmul.f32.gmra.mxu3 %v2423_v45  ;;  %v2533_v33 = vsel %vm24_vm0, %v1925_v22, %v2069_v0 }
  0x32   :  { %1251 = vmatpush.msrb.mxu1 %v2125_v16  ;;  %v2466_v16 = vsel %vm24_vm0, %v1898_v11, %v2069_v0  ;;  %v1199_v3 = vadd.f32 %v1198_v61, %v2450_v12  ;;  %v431_v61 = vsel %vm24_vm0, %v1912_v53, %v2069_v0  ;;  %v1931_v53 = vld [vmem:[%s3738_s2 + $0x1c0] sm:$0xff] }
  0x34   :  { %1252 = vmatpush.msrb.mxu1 %v2143_v20  ;;  %v2484_v20 = vsel %vm24_vm0, %v1899_v60, %v2069_v0  ;;  %v1200_v9 = vadd.f32 %v1199_v3, %v2466_v16 }
  0x36   :  { %1253 = vmatpush.msrb.mxu1 %v2161_v24  ;;  %v1902_v24 = vld [vmem:[%s3738_s2 + $0xd8] sm:$0xff]  ;;  %v1201_v19 = vadd.f32 %v1200_v9, %v2484_v20  ;;  %v1916_v9 = vld [vmem:[%s3738_s2 + $0x148] sm:$0xff] }
  0x38   :  { %991 = vmatmul.f32.gmra.mxu0 %v2111_v13  ;;  %1039 = vmatmul.f32.gmra.mxu1 %v222_v7  ;;  %v2505_v13 = vsel %vm24_vm0, %v1901_v8, %v2069_v0  ;;  %v1202_v28 = vadd.f32 %v1201_v19, %v2494_v14  ;;  %v1904_v7 = vld [vmem:[%s3738_s2 + $0xe8] sm:$0xff] }
  0x39   :  { %1081 = vmatmul.f32.gmra.mxu2 %v376_v4  ;;  %1132 = vmatmul.f32.gmra.mxu3 %v2478_v5  ;;  %v2546_v40 = vsel %vm24_vm0, %v1904_v7, %v2069_v0 }
  0x3a   :  { %1254 = vmatpush.msrb.mxu1 %v2178_v27  ;;  %v2521_v27 = vsel %vm24_vm0, %v1902_v24, %v2069_v0  ;;  %v1203_v29 = vadd.f32 %v1202_v28, %v2505_v13  ;;  %v1918_v28 = vld [vmem:[%s3738_s2 + $0x158] sm:$0xff] }
  0x3c   :  { %1255 = vmatpush.msrb.mxu1 %v2196_v31  ;;  %v2539_v31 = vsel %vm24_vm0, %v1903_v25, %v2069_v0  ;;  %v1204_v36 = vadd.f32 %v1203_v29, %v2521_v27  ;;  %v2641_v25 = vsel %vm24_vm0, %v1916_v9, %v2069_v0  ;;  %v2649_v29 = vsel %vm24_vm0, %v1917_v21, %v2069_v0 }
  0x3e   :  { %1256 = vmatpush.msrb.mxu1 %v2214_v35  ;;  %v1205_v35 = vadd.f32 %v1204_v36, %v2539_v31  ;;  %v2661_v36 = vsel %vm24_vm0, %v1918_v28, %v2069_v0 }
  0x40   :  { %994 = vmatmul.f32.gmra.mxu0 %v2130_v17  ;;  %1042 = vmatmul.f32.gmra.mxu1 %v233_v37  ;;  %v1926_v17 = vld [vmem:[%s3738_s2 + $0x198] sm:$0xff]  ;;  %v1206_v37 = vadd.f32 %v1205_v35, %v2546_v40  ;;  %v1920_v35 = vld [vmem:[%s3738_s2 + $0x168] sm:$0xff] }
  0x41   :  { %1084 = vmatmul.f32.gmra.mxu2 %v387_v32  ;;  %1135 = vmatmul.f32.gmra.mxu3 %v2533_v33 }
  0x42   :  { %1257 = vmatpush.msrb.mxu1 %v2232_v39  ;;  %v1207_v48 = vadd.f32 %v1206_v37, %v2373_v15  ;;  %v2566_v39 = vsel %vm24_vm0, %v1926_v17, %v2069_v0 }
  0x44   :  { %1258 = vmatpush.msrb.mxu1 %v2250_v43  ;;  %v1208_v11 = vadd.f32 %v1207_v48, %v2418_v44  ;;  %v1910_v43 = vld [vmem:[%s3738_s2 + $0x118] sm:$0xff]  ;;  %v1921_v48 = vld [vmem:[%s3738_s2 + $0x170] sm:$0xff] }
  0x46   :  { %1259 = vmatpush.msrb.mxu1 %v2268_v47  ;;  %v1209_v15 = vadd.f32 %v1208_v11, %v376_v4  ;;  %v1927_v47 = vld [vmem:[%s3738_s2 + $0x1a0] sm:$0xff]  ;;  %v2684_v11 = vsel %vm24_vm0, %v1920_v35, %v2069_v0 }
  0x47   :  { %v2593_v56 = vsel %vm24_vm0, %v1927_v47, %v2069_v0 }
  0x48   :  { %997 = vmatmul.f32.gmra.mxu0 %v2154_v23  ;;  %1045 = vmatmul.f32.gmra.mxu1 %v2429_v10  ;;  %v1911_v23 = vld [vmem:[%s3738_s2 + $0x120] sm:$0xff]  ;;  %v1210_v44 = vadd.f32 %v1209_v15, %v387_v32  ;;  %v409_v10 = vsel %vm24_vm0, %v1910_v43, %v2069_v0  ;;  %v2690_v15 = vsel %vm24_vm0, %v1921_v48, %v2069_v0 }
  0x49   :  { %1087 = vmatmul.f32.gmra.mxu2 %v398_v49  ;;  %1138 = vmatmul.f32.gmra.mxu3 %v2566_v39  ;;  %v420_v57 = vsel %vm24_vm0, %v1911_v23, %v2069_v0 }
  0x4a   :  { %1260 = vmatpush.msrb.mxu1 %v2286_v51  ;;  %v1211_v51 = vadd.f32 %v1210_v44, %v398_v49 }
  0x4c   :  { %1261 = vmatpush.msrb.mxu1 %v2304_v55  ;;  %v1913_v55 = vld [vmem:[%s3738_s2 + $0x130] sm:$0xff]  ;;  %v1212_v60 = vadd.f32 %v1211_v51, %v409_v10 }
  0x4d   :  { %v442_v3 = vsel %vm24_vm0, %v1913_v55, %v2069_v0 }
  0x4e   :  { %1262 = vmatpush.msrb.mxu1 %v2322_v59  ;;  %v1914_v59 = vld [vmem:[%s3738_s2 + $0x138] sm:$0xff]  ;;  %v1213_v62 = vadd.f32 %v1212_v60, %v420_v57 }
  0x4f   :  { %v453_v8 = vsel %vm24_vm0, %v1914_v59, %v2069_v0 }
  0x50   :  { %1000 = vmatmul.f32.gmra.mxu0 %v2171_v26  ;;  %1048 = vmatmul.f32.gmra.mxu1 %v2438_v52  ;;  %v1928_v26 = vld [vmem:[%s3738_s2 + $0x1a8] sm:$0xff]  ;;  %v1915_v52 = vld [vmem:[%s3738_s2 + $0x140] sm:$0xff]  ;;  %v1214_v4 = vadd.f32 %v1213_v62, %v431_v61 }
  0x51   :  { %1090 = vmatmul.f32.gmra.mxu2 %v409_v10  ;;  %1141 = vmatmul.f32.gmra.mxu3 %v2593_v56  ;;  %v464_v19 = vsel %vm24_vm0, %v1915_v52, %v2069_v0 }
  0x52   :  { %1263 = vmatpush.msrb.mxu1 %v2343_v1  ;;  %v1215_v24 = vadd.f32 %v1214_v4, %v442_v3  ;;  %v607_v1 = vsel %vm24_vm0, %v1928_v26, %v2069_v0  ;;  %v1937_v26 = vld [vmem:[%s3738_s2 + $0x1f0] sm:$0xff] }
  0x54   :  { %v1216_v22 = vadd.f32 %v1215_v24, %v453_v8  ;;  %v706_v24 = vsel %vm24_vm0, %v1937_v26, %v2069_v0 }
  0x56   :  { %v1217_v7 = vadd.f32 %v1216_v22, %v464_v19 }
  0x58   :  { %1003 = vmatmul.f32.gmra.mxu0 %v2189_v30  ;;  %1051 = vmatmul.f32.gmra.mxu1 %v2450_v12  ;;  %v1929_v30 = vld [vmem:[%s3738_s2 + $0x1b0] sm:$0xff]  ;;  %v1919_v12 = vld [vmem:[%s3738_s2 + $0x160] sm:$0xff]  ;;  %v1218_v32 = vadd.f32 %v1217_v7, %v2641_v25 }
  0x59   :  { %1093 = vmatmul.f32.gmra.mxu2 %v420_v57  ;;  %1144 = vmatmul.f32.gmra.mxu3 %v607_v1  ;;  %v618_v17 = vsel %vm24_vm0, %v1929_v30, %v2069_v0  ;;  %v2673_v37 = vsel %vm24_vm0, %v1919_v12, %v2069_v0 }
  0x5a   :  { %v1219_v41 = vadd.f32 %v1218_v32, %v2649_v29 }
  0x5c   :  { %v1220_v49 = vadd.f32 %v1219_v41, %v2661_v36 }
  0x5e   :  { %v1221_v43 = vadd.f32 %v1220_v49, %v2673_v37 }
  0x60   :  { %1006 = vmatmul.f32.gmra.mxu0 %v2207_v34  ;;  %1054 = vmatmul.f32.gmra.mxu1 %v2466_v16  ;;  %v1930_v34 = vld [vmem:[%s3738_s2 + $0x1b8] sm:$0xff]  ;;  %v1222_v16 = vadd.f32 %v1221_v43, %v2684_v11 }
  0x61   :  { %1096 = vmatmul.f32.gmra.mxu2 %v431_v61  ;;  %1147 = vmatmul.f32.gmra.mxu3 %v618_v17  ;;  %v629_v23 = vsel %vm24_vm0, %v1930_v34, %v2069_v0  ;;  %v1935_v61 = vld [vmem:[%s3738_s2 + $0x1e0] sm:$0xff] }
  0x62   :  { %v1223_v47 = vadd.f32 %v1222_v16, %v2690_v15 }
  0x64   :  { %v1224_v44 = vadd.f32 %v1223_v47, %v2378_v18  ;;  %v640_v18 = vsel %vm24_vm0, %v1931_v53, %v2069_v0 }
  0x66   :  { %v1225_v10 = vadd.f32 %v1224_v44, %v2423_v45 }
  0x68   :  { %1009 = vmatmul.f32.gmra.mxu0 %v2225_v38  ;;  %1057 = vmatmul.f32.gmra.mxu1 %v2484_v20  ;;  %v1226_v51 = vadd.f32 %v1225_v10, %v2478_v5  ;;  %v1932_v5 = vld [vmem:[%s3738_s2 + $0x1c8] sm:$0xff] }
  0x69   :  { %1099 = vmatmul.f32.gmra.mxu2 %v442_v3  ;;  %1150 = vmatmul.f32.gmra.mxu3 %v629_v23  ;;  %v651_v55 = vsel %vm24_vm0, %v1932_v5, %v2069_v0  ;;  %v684_v3 = vsel %vm24_vm0, %v1935_v61, %v2069_v0 }
  0x6a   :  { %v1227_v57 = vadd.f32 %v1226_v51, %v2533_v33 }
  0x6c   :  { %v1228_v38 = vadd.f32 %v1227_v57, %v2566_v39 }
  0x6e   :  { %v1229_v45 = vadd.f32 %v1228_v38, %v2593_v56 }
  0x70   :  { %1012 = vmatmul.f32.gmra.mxu0 %v2243_v42  ;;  %1060 = vmatmul.f32.gmra.mxu1 %v2494_v14  ;;  %v1230_v20 = vadd.f32 %v1229_v45, %v607_v1  ;;  %v1933_v42 = vld [vmem:[%s3738_s2 + $0x1d0] sm:$0xff]  ;;  %v1934_v14 = vld [vmem:[%s3738_s2 + $0x1d8] sm:$0xff] }
  0x71   :  { %1102 = vmatmul.f32.gmra.mxu2 %v453_v8  ;;  %1153 = vmatmul.f32.gmra.mxu3 %v640_v18  ;;  %v662_v60 = vsel %vm24_vm0, %v1933_v42, %v2069_v0  ;;  %v1938_v8 = vld [vmem:[%s3738_s2 + $0x1f8] sm:$0xff] }
  0x72   :  { %v1231_v33 = vadd.f32 %v1230_v20, %v618_v17 }
  0x74   :  { %v1232_v39 = vadd.f32 %v1231_v33, %v629_v23 }
  0x76   :  { %v1233_v56 = vadd.f32 %v1232_v39, %v640_v18 }
  0x78   :  { %1015 = vmatmul.f32.gmra.mxu0 %v2261_v46  ;;  %1063 = vmatmul.f32.gmra.mxu1 %v2505_v13  ;;  %v1234_v59 = vadd.f32 %v1233_v56, %v651_v55  ;;  %v673_v46 = vsel %vm24_vm0, %v1934_v14, %v2069_v0  ;;  %v1936_v13 = vld [vmem:[%s3738_s2 + $0x1e8] sm:$0xff] }
  0x79   :  { %1105 = vmatmul.f32.gmra.mxu2 %v464_v19  ;;  %1156 = vmatmul.f32.gmra.mxu3 %v651_v55  ;;  %v695_v4 = vsel %vm24_vm0, %v1936_v13, %v2069_v0 }
  0x7a   :  { %v1235_v62 = vadd.f32 %v1234_v59, %v662_v60 }
  0x7c   :  { %v1236_v52 = vadd.f32 %v1235_v62, %v673_v46 }
  0x7e   :  { %v1237_v9 = vadd.f32 %v1236_v52, %v684_v3 }
  0x80   :  { %1018 = vmatmul.f32.gmra.mxu0 %v2279_v50  ;;  %1066 = vmatmul.f32.gmra.mxu1 %v2521_v27  ;;  %v1238_v1 = vadd.f32 %v1237_v9, %v695_v4  ;;  %v717_v50 = vsel %vm24_vm0, %v1938_v8, %v2069_v0 }
  0x81   :  { %1108 = vmatmul.f32.gmra.mxu2 %v2641_v25  ;;  %1159 = vmatmul.f32.gmra.mxu3 %v662_v60 }
  0x82   :  { %v1239_v27 = vadd.f32 %v1238_v1, %v706_v24 }
  0x84   :  { %v1240_v19 = vadd.f32 %v1239_v27, %v717_v50 }
  0x86   :  { %v1241_v21 = vrot.slane %v1240_v19, 4 }
  0x88   :  { %1021 = vmatmul.f32.gmra.mxu0 %v2297_v54  ;;  %1069 = vmatmul.f32.gmra.mxu1 %v2539_v31  ;;  %v1242_v22 = vadd.f32 %v1241_v21, %v1240_v19 }
  0x89   :  { %1111 = vmatmul.f32.gmra.mxu2 %v2649_v29  ;;  %1162 = vmatmul.f32.gmra.mxu3 %v673_v46 }
  0x8a   :  { %v1243_v25 = vrot.slane %v1242_v22, 2 }
  0x8c   :  { %v1244_v28 = vadd.f32 %v1243_v25, %v1242_v22 }
  0x8e   :  { %v1245_v0 = vrot.slane %v1244_v28, 1 }
  0x90   :  { %1024 = vmatmul.f32.gmra.mxu0 %v2315_v58  ;;  %1072 = vmatmul.f32.gmra.mxu1 %v2546_v40  ;;  %v1246_v2 = vadd.f32 %v1245_v0, %v1244_v28 }
  0x91   :  { %1114 = vmatmul.f32.gmra.mxu2 %v2661_v36  ;;  %1165 = vmatmul.f32.gmra.mxu3 %v684_v3 }
  0x92   :  { %v1247_v7 = vmul.f32 0.001953125, %v1246_v2 }
  0x98   :  { %1027 = vmatmul.f32.gmra.mxu0 %v2336_v63  ;;  %1264 = vmatmul.f32.vlgmr.msrb.gmra.mxu1 %v1247_v7 }
  0x99   :  { %1117 = vmatmul.f32.gmra.mxu2 %v2673_v37  ;;  %1168 = vmatmul.f32.gmra.mxu3 %v695_v4 }
  0xa0   :  { %1030 = vmatmul.f32.gmra.mxu0 %v2357_v6 }
  0xa1   :  { %1120 = vmatmul.f32.gmra.mxu2 %v2684_v11  ;;  %1171 = vmatmul.f32.gmra.mxu3 %v706_v24 }
  0xa5   :  { %v2773_v54 = vpop.f32.mrf.mxu1  ;;  %v986_v31 = vpop.f32.mrf.mxu0 }
  0xa9   :  { %1123 = vmatmul.f32.gmra.mxu2 %v2690_v15  ;;  %1174 = vmatmul.f32.gmra.mxu3 %v717_v50 }
  0xac   :  { %v2792_v48 = vpop.f32.mrf.mxu2  ;;  %v2798_v15 = vpop.f32.mrf.mxu3 }
  0xad   :  { %v2776_v58 = vpop.f32.mrf.mxu1  ;;  %v989_v63 = vpop.f32.mrf.mxu0 }
  0xb4   :  { %v2796_v43 = vpop.f32.mrf.mxu2  ;;  %v2804_v23 = vpop.f32.mrf.mxu3 }
  0xb5   :  { %v2778_v40 = vpop.f32.mrf.mxu1  ;;  %v992_v12 = vpop.f32.mrf.mxu0 }
  0xbc   :  { %v2802_v47 = vpop.f32.mrf.mxu2  ;;  %v2810_v51 = vpop.f32.mrf.mxu3 }
  0xbd   :  { %v2780_v29 = vpop.f32.mrf.mxu1  ;;  %v995_v32 = vpop.f32.mrf.mxu0 }
  0xc4   :  { %v2808_v53 = vpop.f32.mrf.mxu2  ;;  %v2816_v45 = vpop.f32.mrf.mxu3 }
  0xc5   :  { %v2782_v30 = vpop.f32.mrf.mxu1  ;;  %v998_v35 = vpop.f32.mrf.mxu0 }
  0xcc   :  { %v2814_v38 = vpop.f32.mrf.mxu2  ;;  %v2820_v55 = vpop.f32.mrf.mxu3 }
  0xcd   :  { %v2784_v6 = vpop.f32.mrf.mxu1  ;;  %v1001_v17 = vpop.f32.mrf.mxu0 }
  0xd4   :  { %v1091_v33 = vpop.f32.mrf.mxu2  ;;  %v1142_v61 = vpop.f32.mrf.mxu3 }
  0xd5   :  { %v2786_v36 = vpop.f32.mrf.mxu1  ;;  %v1004_v11 = vpop.f32.mrf.mxu0 }
  0xdc   :  { %v2827_v60 = vpop.f32.mrf.mxu2 }
  0xdd   :  { %v2788_v41 = vpop.f32.mrf.mxu1  ;;  %v1007_v16 = vpop.f32.mrf.mxu0 }
  0xe4   :  { %v2832_v13 = vpop.f32.mrf.mxu2 }
  0xe5   :  { %v2790_v37 = vpop.f32.mrf.mxu1  ;;  %v1010_v10 = vpop.f32.mrf.mxu0 }
  0xec   :  { %v2855_v27 = vpop.f32.mrf.mxu2 }
  0xed   :  { %v2794_v49 = vpop.f32.mrf.mxu1  ;;  %v1013_v18 = vpop.f32.mrf.mxu0 }
  0xf5   :  { %v2800_v34 = vpop.f32.mrf.mxu1  ;;  %v1016_v20 = vpop.f32.mrf.mxu0 }
  0xfd   :  { %v2806_v44 = vpop.f32.mrf.mxu1  ;;  %v1019_v14 = vpop.f32.mrf.mxu0 }
 0x105   :  { %v2812_v57 = vpop.f32.mrf.mxu1  ;;  %v1022_v46 = vpop.f32.mrf.mxu0 }
 0x10d   :  { %v2818_v5 = vpop.f32.mrf.mxu1  ;;  %v1025_v9 = vpop.f32.mrf.mxu0 }
 0x115   :  { %v1265_v42 = vpop.f32.mrf.mxu1 }
 0x116   :  { %v2822_v39 = vperm.slane %v1265_v42, 0 }
 0x118   :  { %v2825_v56 = vsub.f32 %v1091_v33, %v2822_v39  ;;  %v2830_v59 = vsub.f32 %v1142_v61, %v2822_v39  ;;  %v2835_v62 = vsub.f32 %v986_v31, %v2822_v39  ;;  %v2838_v3 = vsub.f32 %v989_v63, %v2822_v39  ;;  %v2882_v33 = vpop.f32.mrf.mxu2 }
 0x119   :  { %v2841_v26 = vsub.f32 %v992_v12, %v2822_v39  ;;  %v2848_v8 = vsub.f32 %v995_v32, %v2822_v39  ;;  %v2851_v24 = vsub.f32 %v998_v35, %v2822_v39  ;;  %v2858_v19 = vsub.f32 %v1001_v17, %v2822_v39  ;;  %v1028_v35 = vpop.f32.mrf.mxu0 }
 0x11a   :  { %v1333_v52 = vmul.f32 %v2835_v62, %v2835_v62  ;;  %v1334_v4 = vmul.f32 %v2838_v3, %v2838_v3  ;;  %v2863_v25 = vsub.f32 %v1004_v11, %v2822_v39  ;;  %v2868_v2 = vsub.f32 %v1007_v16, %v2822_v39 }
 0x11b   :  { %3762 = vst [vmem:[#allocation14_spill] sm:$0xff] %v2851_v24  ;;  %v1335_v1 = vmul.f32 %v2841_v26, %v2841_v26  ;;  %v1336_v21 = vmul.f32 %v2848_v8, %v2848_v8  ;;  %v1337_v28 = vmul.f32 %v2851_v24, %v2851_v24  ;;  %v1338_v7 = vmul.f32 %v2858_v19, %v2858_v19 }
 0x11c   :  { %v1397_v50 = vadd.f32 %v1334_v4, %v1333_v52  ;;  %3763 = vst [vmem:[#allocation15_spill] sm:$0xff] %v2858_v19  ;;  %v2873_v63 = vsub.f32 %v1010_v10, %v2822_v39  ;;  %v1339_v12 = vmul.f32 %v2863_v25, %v2863_v25  ;;  %v2878_v17 = vsub.f32 %v1013_v18, %v2822_v39 }
 0x11d   :  { %3764 = vst [vmem:[#allocation16_spill] sm:$0xff] %v2863_v25  ;;  %v1340_v11 = vmul.f32 %v2868_v2, %v2868_v2  ;;  %v2885_v42 = vsub.f32 %v1016_v20, %v2822_v39  ;;  %v2890_v52 = vsub.f32 %v1019_v14, %v2822_v39 }
 0x11e   :  { %v1398_v22 = vadd.f32 %v1397_v50, %v1335_v1  ;;  %3765 = vst [vmem:[#allocation17_spill] sm:$0xff] %v2868_v2  ;;  %v1341_v10 = vmul.f32 %v2873_v63, %v2873_v63  ;;  %v1342_v18 = vmul.f32 %v2878_v17, %v2878_v17  ;;  %v2894_v1 = vpop.f32.mrf.mxu3  ;;  %v2897_v50 = vsub.f32 %v1022_v46, %v2822_v39 }
 0x11f   :  { %v1343_v20 = vmul.f32 %v2885_v42, %v2885_v42  ;;  %v1344_v14 = vmul.f32 %v2890_v52, %v2890_v52 }
 0x120   :  { %v1399_v0 = vadd.f32 %v1398_v22, %v1336_v21  ;;  %v2902_v22 = vsub.f32 %v1025_v9, %v2822_v39 }
 0x122   :  { %v1400_v31 = vadd.f32 %v1399_v0, %v1337_v28  ;;  %v1031_v0 = vpop.f32.mrf.mxu0 }
 0x123   :  { %v2916_v9 = vsub.f32 %v1031_v0, %v2822_v39 }
 0x124   :  { %v1401_v32 = vadd.f32 %v1400_v31, %v1338_v7  ;;  %v2907_v7 = vsub.f32 %v1028_v35, %v2822_v39  ;;  %v1345_v31 = vmul.f32 %v2897_v50, %v2897_v50 }
 0x126   :  { %v1402_v16 = vadd.f32 %v1401_v32, %v1339_v12  ;;  %v2911_v12 = vpop.f32.mrf.mxu2  ;;  %v1346_v32 = vmul.f32 %v2902_v22, %v2902_v22  ;;  %v1347_v35 = vmul.f32 %v2907_v7, %v2907_v7 }
 0x128   :  { %v1403_v61 = vadd.f32 %v1402_v16, %v1340_v11  ;;  %v2920_v16 = vsub.f32 %v2773_v54, %v2822_v39 }
 0x12a   :  { %v1404_v4 = vadd.f32 %v1403_v61, %v1341_v10  ;;  %v2924_v61 = vpop.f32.mrf.mxu3  ;;  %v1349_v54 = vmul.f32 %v2920_v16, %v2920_v16 }
 0x12c   :  { %v1405_v21 = vadd.f32 %v1404_v4, %v1342_v18  ;;  %v2928_v18 = vsub.f32 %v2776_v58, %v2822_v39  ;;  %v1348_v4 = vmul.f32 %v2916_v9, %v2916_v9 }
 0x12e   :  { %v1406_v28 = vadd.f32 %v1405_v21, %v1343_v20  ;;  %v2934_v21 = vsub.f32 %v2778_v40, %v2822_v39  ;;  %v1350_v58 = vmul.f32 %v2928_v18, %v2928_v18 }
 0x130   :  { %v1407_v46 = vadd.f32 %v1406_v28, %v1344_v14  ;;  %v2940_v28 = vsub.f32 %v2780_v29, %v2822_v39  ;;  %v1351_v40 = vmul.f32 %v2934_v21, %v2934_v21 }
 0x132   :  { %v1408_v11 = vadd.f32 %v1407_v46, %v1345_v31  ;;  %v2944_v31 = vpop.f32.mrf.mxu2  ;;  %v2948_v46 = vsub.f32 %v2782_v30, %v2822_v39  ;;  %v1352_v29 = vmul.f32 %v2940_v28, %v2940_v28 }
 0x134   :  { %v1409_v10 = vadd.f32 %v1408_v11, %v1346_v32  ;;  %3766 = vst [vmem:[#allocation18_spill] sm:$0xff] %v2948_v46  ;;  %v2954_v11 = vsub.f32 %v2784_v6, %v2822_v39  ;;  %v1353_v30 = vmul.f32 %v2948_v46, %v2948_v46 }
 0x136   :  { %v1410_v20 = vadd.f32 %v1409_v10, %v1347_v35  ;;  %3767 = vst [vmem:[#allocation19_spill] sm:$0xff] %v2954_v11  ;;  %v2958_v10 = vpop.f32.mrf.mxu3  ;;  %v1354_v6 = vmul.f32 %v2954_v11, %v2954_v11 }
 0x138   :  { %v1411_v14 = vadd.f32 %v1410_v20, %v1348_v4  ;;  %v2962_v4 = vsub.f32 %v2786_v36, %v2822_v39 }
 0x13a   :  { %v1412_v0 = vadd.f32 %v1411_v14, %v1349_v54  ;;  %3768 = vst [vmem:[#allocation20_spill] sm:$0xff] %v2962_v4  ;;  %v2968_v54 = vsub.f32 %v2788_v41, %v2822_v39  ;;  %v1355_v36 = vmul.f32 %v2962_v4, %v2962_v4 }
 0x13c   :  { %v1413_v32 = vadd.f32 %v1412_v0, %v1350_v58  ;;  %3769 = vst [vmem:[#allocation21_spill] sm:$0xff] %v2968_v54  ;;  %v2974_v58 = vsub.f32 %v2790_v37, %v2822_v39  ;;  %v1356_v41 = vmul.f32 %v2968_v54, %v2968_v54 }
 0x13e   :  { %v1414_v35 = vadd.f32 %v1413_v32, %v1351_v40  ;;  %v1112_v40 = vpop.f32.mrf.mxu2  ;;  %v2980_v32 = vsub.f32 %v2794_v49, %v2822_v39  ;;  %v1357_v37 = vmul.f32 %v2974_v58, %v2974_v58 }
 0x140   :  { %v1415_v20 = vadd.f32 %v1414_v35, %v1352_v29  ;;  %v2986_v35 = vsub.f32 %v2800_v34, %v2822_v39  ;;  %v1358_v49 = vmul.f32 %v2980_v32, %v2980_v32 }
 0x142   :  { %v1416_v14 = vadd.f32 %v1415_v20, %v1353_v30  ;;  %v2990_v20 = vpop.f32.mrf.mxu3  ;;  %v1359_v34 = vmul.f32 %v2986_v35, %v2986_v35 }
 0x144   :  { %v1417_v0 = vadd.f32 %v1416_v14, %v1354_v6  ;;  %v2994_v6 = vsub.f32 %v2806_v44, %v2822_v39 }
 0x146   :  { %v1418_v29 = vadd.f32 %v1417_v0, %v1355_v36  ;;  %v3000_v36 = vsub.f32 %v2812_v57, %v2822_v39  ;;  %v1360_v44 = vmul.f32 %v2994_v6, %v2994_v6  ;;  %v1115_v2 = vpop.f32.mrf.mxu2 }
 0x148   :  { %v1419_v30 = vadd.f32 %v1418_v29, %v1356_v41  ;;  %v3006_v41 = vsub.f32 %v2818_v5, %v2822_v39  ;;  %v1361_v57 = vmul.f32 %v3000_v36, %v3000_v36 }
 0x14a   :  { %v1420_v14 = vadd.f32 %v1419_v30, %v1357_v37  ;;  %v3012_v37 = vsub.f32 %v2792_v48, %v2822_v39  ;;  %v1362_v5 = vmul.f32 %v3006_v41, %v3006_v41  ;;  %v3022_v54 = vpop.f32.mrf.mxu3 }
 0x14c   :  { %v1421_v0 = vadd.f32 %v1420_v14, %v1358_v49  ;;  %v3018_v49 = vsub.f32 %v2796_v43, %v2822_v39  ;;  %v1363_v48 = vmul.f32 %v3012_v37, %v3012_v37 }
 0x14e   :  { %v1422_v29 = vadd.f32 %v1421_v0, %v1359_v34  ;;  %v3026_v34 = vsub.f32 %v2802_v47, %v2822_v39  ;;  %v1364_v43 = vmul.f32 %v3018_v49, %v3018_v49  ;;  %v1118_v25 = vpop.f32.mrf.mxu2 }
 0x150   :  { %v1423_v30 = vadd.f32 %v1422_v29, %v1360_v44  ;;  %v3032_v44 = vsub.f32 %v2808_v53, %v2822_v39  ;;  %v1365_v47 = vmul.f32 %v3026_v34, %v3026_v34  ;;  %v3046_v53 = vsub.f32 %v2827_v60, %v2822_v39 }
 0x152   :  { %v1424_v14 = vadd.f32 %v1423_v30, %v1361_v57  ;;  %v3038_v57 = vsub.f32 %v2814_v38, %v2822_v39  ;;  %3770 = vst [vmem:[#allocation22_spill] sm:$0xff] %v3046_v53  ;;  %v3050_v4 = vpop.f32.mrf.mxu3  ;;  %v3054_v38 = vsub.f32 %v2832_v13, %v2822_v39  ;;  %v1369_v60 = vmul.f32 %v3046_v53, %v3046_v53 }
 0x153   :  { %v3153_v53 = vsub.f32 %v2958_v10, %v2822_v39 }
 0x154   :  { %v1425_v0 = vadd.f32 %v1424_v14, %v1362_v5  ;;  %v1366_v5 = vmul.f32 %v3032_v44, %v3032_v44  ;;  %3771 = vst [vmem:[#allocation23_spill] sm:$0xff] %v3054_v38  ;;  %v1370_v13 = vmul.f32 %v3054_v38, %v3054_v38  ;;  %v3088_v38 = vsub.f32 %v1115_v2, %v2822_v39 }
 0x155   :  { %3774 = vst [vmem:[#allocation26_spill] sm:$0xff] %v3153_v53  ;;  %v1388_v10 = vmul.f32 %v3153_v53, %v3153_v53 }
 0x156   :  { %v1426_v29 = vadd.f32 %v1425_v0, %v1363_v48  ;;  %v1367_v48 = vmul.f32 %v3038_v57, %v3038_v57  ;;  %v1121_v19 = vpop.f32.mrf.mxu2 }
 0x158   :  { %v1427_v30 = vadd.f32 %v1426_v29, %v1364_v43  ;;  %v1368_v43 = vmul.f32 %v2825_v56, %v2825_v56 }
 0x15a   :  { %v1428_v14 = vadd.f32 %v1427_v30, %v1365_v47  ;;  %v3060_v47 = vsub.f32 %v2855_v27, %v2822_v39  ;;  %v1163_v11 = vpop.f32.mrf.mxu3 }
 0x15b   :  { %v3176_v46 = vsub.f32 %v1163_v11, %v2822_v39 }
 0x15c   :  { %v1429_v0 = vadd.f32 %v1428_v14, %v1366_v5  ;;  %3772 = vst [vmem:[#allocation24_spill] sm:$0xff] %v3060_v47  ;;  %v3066_v5 = vsub.f32 %v2882_v33, %v2822_v39  ;;  %v1371_v27 = vmul.f32 %v3060_v47, %v3060_v47 }
 0x15d   :  { %3778 = vst [vmem:[#allocation30_spill] sm:$0xff] %v3176_v46 }
 0x15e   :  { %v1430_v29 = vadd.f32 %v1429_v0, %v1367_v48  ;;  %3773 = vst [vmem:[#allocation25_spill] sm:$0xff] %v3066_v5  ;;  %v3072_v48 = vsub.f32 %v2911_v12, %v2822_v39  ;;  %v1372_v33 = vmul.f32 %v3066_v5, %v3066_v5  ;;  %v1376_v5 = vmul.f32 %v3088_v38, %v3088_v38 }
 0x160   :  { %v1431_v30 = vadd.f32 %v1430_v29, %v1368_v43  ;;  %v3078_v43 = vsub.f32 %v2944_v31, %v2822_v39  ;;  %v1373_v12 = vmul.f32 %v3072_v48, %v3072_v48 }
 0x162   :  { %v1432_v14 = vadd.f32 %v1431_v30, %v1369_v60  ;;  %v3083_v60 = vsub.f32 %v1112_v40, %v2822_v39  ;;  %v1124_v40 = vpop.f32.mrf.mxu2 }
 0x164   :  { %v1433_v0 = vadd.f32 %v1432_v14, %v1370_v13  ;;  %v1374_v13 = vmul.f32 %v3078_v43, %v3078_v43  ;;  %v3093_v14 = vsub.f32 %v1118_v25, %v2822_v39  ;;  %v1166_v25 = vpop.f32.mrf.mxu3 }
 0x166   :  { %v1434_v29 = vadd.f32 %v1433_v0, %v1371_v27  ;;  %v1375_v27 = vmul.f32 %v3083_v60, %v3083_v60 }
 0x168   :  { %v1435_v30 = vadd.f32 %v1434_v29, %v1372_v33  ;;  %v3100_v33 = vsub.f32 %v1121_v19, %v2822_v39  ;;  %v1377_v29 = vmul.f32 %v3093_v14, %v3093_v14  ;;  %v3115_v19 = vsub.f32 %v2804_v23, %v2822_v39 }
 0x16a   :  { %v1436_v31 = vadd.f32 %v1435_v30, %v1373_v12  ;;  %v3105_v12 = vsub.f32 %v1124_v40, %v2822_v39  ;;  %v3109_v30 = vsub.f32 %v2798_v15, %v2822_v39  ;;  %v1381_v23 = vmul.f32 %v3115_v19, %v3115_v19 }
 0x16c   :  { %v1437_v0 = vadd.f32 %v1436_v31, %v1374_v13  ;;  %v1378_v13 = vmul.f32 %v3100_v33, %v3100_v33  ;;  %v1380_v15 = vmul.f32 %v3109_v30, %v3109_v30 }
 0x16e   :  { %v1438_v2 = vadd.f32 %v1437_v0, %v1375_v27  ;;  %v3121_v0 = vsub.f32 %v2810_v51, %v2822_v39 }
 0x170   :  { %v1439_v47 = vadd.f32 %v1438_v2, %v1376_v5  ;;  %v1379_v5 = vmul.f32 %v3105_v12, %v3105_v12  ;;  %v3127_v2 = vsub.f32 %v2816_v45, %v2822_v39  ;;  %v1382_v51 = vmul.f32 %v3121_v0, %v3121_v0 }
 0x171   :  { %v3141_v45 = vsub.f32 %v2894_v1, %v2822_v39 }
 0x172   :  { %v1440_v31 = vadd.f32 %v1439_v47, %v1377_v29  ;;  %v3133_v29 = vsub.f32 %v2820_v55, %v2822_v39  ;;  %v3147_v55 = vsub.f32 %v2924_v61, %v2822_v39 }
 0x173   :  { %v1386_v1 = vmul.f32 %v3141_v45, %v3141_v45 }
 0x174   :  { %v1441_v27 = vadd.f32 %v1440_v31, %v1378_v13  ;;  %v1169_v31 = vpop.f32.mrf.mxu3  ;;  %v1387_v61 = vmul.f32 %v3147_v55, %v3147_v55 }
 0x175   :  { %v3188_v24 = vsub.f32 %v1169_v31, %v2822_v39 }
 0x176   :  { %v1442_v40 = vadd.f32 %v1441_v27, %v1379_v5  ;;  %v1383_v27 = vmul.f32 %v3127_v2, %v3127_v2 }
 0x177   :  { %3780 = vst [vmem:[#allocation32_spill] sm:$0xff] %v3188_v24 }
 0x178   :  { %v1443_v47 = vadd.f32 %v1442_v40, %v1380_v15  ;;  %v1384_v15 = vmul.f32 %v3133_v29, %v3133_v29 }
 0x17a   :  { %v1444_v13 = vadd.f32 %v1443_v47, %v1381_v23  ;;  %v1385_v23 = vmul.f32 %v2830_v59, %v2830_v59 }
 0x17c   :  { %v1445_v5 = vadd.f32 %v1444_v13, %v1382_v51  ;;  %v3159_v13 = vsub.f32 %v2990_v20, %v2822_v39 }
 0x17e   :  { %v1446_v40 = vadd.f32 %v1445_v5, %v1383_v27  ;;  %3775 = vst [vmem:[#allocation27_spill] sm:$0xff] %v3159_v13  ;;  %v1172_v5 = vpop.f32.mrf.mxu3  ;;  %v1389_v20 = vmul.f32 %v3159_v13, %v3159_v13 }
 0x180   :  { %v1447_v47 = vadd.f32 %v1446_v40, %v1384_v15  ;;  %v3165_v15 = vsub.f32 %v3022_v54, %v2822_v39 }
 0x182   :  { %v1448_v51 = vadd.f32 %v1447_v47, %v1385_v23  ;;  %3776 = vst [vmem:[#allocation28_spill] sm:$0xff] %v3165_v15  ;;  %v3171_v23 = vsub.f32 %v3050_v4, %v2822_v39  ;;  %v1392_v4 = vmul.f32 %v3176_v46, %v3176_v46 }
 0x184   :  { %v1449_v27 = vadd.f32 %v1448_v51, %v1386_v1  ;;  %3777 = vst [vmem:[#allocation29_spill] sm:$0xff] %v3171_v23  ;;  %v1390_v1 = vmul.f32 %v3165_v15, %v3165_v15  ;;  %v3181_v51 = vsub.f32 %v1166_v25, %v2822_v39 }
 0x186   :  { %v1450_v40 = vadd.f32 %v1449_v27, %v1387_v61  ;;  %3779 = vst [vmem:[#allocation31_spill] sm:$0xff] %v3181_v51  ;;  %v1391_v61 = vmul.f32 %v3171_v23, %v3171_v23  ;;  %v1175_v11 = vpop.f32.mrf.mxu3 }
 0x188   :  { %v1451_v47 = vadd.f32 %v1450_v40, %v1388_v10  ;;  %v1393_v40 = vmul.f32 %v3181_v51, %v3181_v51 }
 0x18a   :  { %v1452_v54 = vadd.f32 %v1451_v47, %v1389_v20  ;;  %v3193_v20 = vsub.f32 %v1172_v5, %v2822_v39  ;;  %v1394_v47 = vmul.f32 %v3188_v24, %v3188_v24 }
 0x18c   :  { %v1453_v27 = vadd.f32 %v1452_v54, %v1390_v1  ;;  %3781 = vst [vmem:[#allocation33_spill] sm:$0xff] %v3193_v20  ;;  %v3198_v1 = vsub.f32 %v1175_v11, %v2822_v39  ;;  %v1395_v31 = vmul.f32 %v3193_v20, %v3193_v20 }
 0x18e   :  { %v1454_v10 = vadd.f32 %v1453_v27, %v1391_v61  ;;  %v1396_v61 = vmul.f32 %v3198_v1, %v3198_v1 }
 0x190   :  { %v1455_v25 = vadd.f32 %v1454_v10, %v1392_v4 }
 0x192   :  { %v1456_v54 = vadd.f32 %v1455_v25, %v1393_v40 }
 0x194   :  { %v1457_v46 = vadd.f32 %v1456_v54, %v1394_v47 }
 0x196   :  { %v1458_v27 = vadd.f32 %v1457_v46, %v1395_v31  ;;  %v1467_v46 = vld [vmem:[%s3736_s0] sm:$0x1] }
 0x198   :  { %v1459_v51 = vadd.f32 %v1458_v27, %v1396_v61 }
 0x19a   :  { %v1460_v23 = vrot.slane %v1459_v51, 4 }
 0x19c   :  { %v1461_v5 = vadd.f32 %v1460_v23, %v1459_v51 }
 0x19e   :  { %v1462_v15 = vrot.slane %v1461_v5, 2 }
 0x1a0   :  { %v1463_v4 = vadd.f32 %v1462_v15, %v1461_v5 }
 0x1a2   :  { %v1464_v10 = vrot.slane %v1463_v4, 1 }
 0x1a4   :  { %v1465_v13 = vadd.f32 %v1464_v10, %v1463_v4 }
 0x1a6   :  { %v1466_v24 = vmul.f32 0.001953125, %v1465_v13 }
 0x1a8   :  { %v1468_v53 = vadd.f32 1e-05, %v1466_v24  ;;  %v3212_v24 = vld [vmem:[%s3737_s1] ss:$0 sm:$0xff] }
 0x1aa   :  { %2034 = vrsqrt.f32 %v1468_v53  ;;  %vm1475_vm3 = vweird.f32 %v1468_v53 }
 0x1b0   :  { %v2035_v39 = vpop.eup %2034 }
 0x1b1   :  { %v1470_v11 = vmul.f32 %v2035_v39, %v1468_v53  ;;  %vm1476_vm2 = vweird.f32 %v2035_v39 }
 0x1b2   :  { %vm1477_vm4 = vmor %vm1475_vm3, %vm1476_vm2 }
 0x1b3   :  { %v1471_v40 = vmul.f32 %v2035_v39, %v1470_v11 }
 0x1b5   :  { %v1472_v25 = vmul.f32 0.5, %v1471_v40 }
 0x1b7   :  { %v1473_v20 = vsub.f32 1.5, %v1472_v25 }
 0x1b9   :  { %v1474_v47 = vmul.f32 %v2035_v39, %v1473_v20 }
 0x1bb   :  { %v1478_v23 = vsel %vm1477_vm4, %v2035_v39, %v1474_v47 }
 0x1bc   :  { %v1479_v15 = vmul.f32 %v1478_v23, %v1467_v46 }
 0x1be   :  { %v3207_v51 = vperm.slane %v1479_v15, 0 }
 0x1c0   :  { %v1515_v13 = vmul.f32 %v3207_v51, %v3026_v34  ;;  %v1499_v53 = vmul.f32 %v3207_v51, %v2920_v16  ;;  %v1483_v20 = vmul.f32 %v3207_v51, %v2835_v62  ;;  %v1484_v54 = vmul.f32 %v3207_v51, %v2838_v3 }
 0x1c1   :  { %v3224_v31 = vmul.f32 %v3207_v51, %v2841_v26  ;;  %v3228_v61 = vmul.f32 %v3207_v51, %v2848_v8  ;;  %v1491_v34 = vmul.f32 %v3207_v51, %v2873_v63  ;;  %v1492_v3 = vmul.f32 %v3207_v51, %v2878_v17 }
 0x1c2   :  { %v1583_v27 = vadd.f32 %v3212_v24, %v1515_v13  ;;  %v1567_v16 = vadd.f32 %v3212_v24, %v1499_v53  ;;  %v1551_v62 = vadd.f32 %v3212_v24, %v1483_v20  ;;  %v1493_v26 = vmul.f32 %v3207_v51, %v2885_v42 }
 0x1c3   :  { %v1494_v5 = vmul.f32 %v3207_v51, %v2890_v52  ;;  %v1500_v8 = vmul.f32 %v3207_v51, %v2928_v18  ;;  %v1516_v63 = vmul.f32 %v3207_v51, %v3032_v44  ;;  %v1495_v11 = vmul.f32 %v3207_v51, %v2897_v50 }
 0x1c4   :  { %v1647_v4 = vmax.f32 %v1583_v27, 0.0  ;;  %v1631_v10 = vmax.f32 %v1567_v16, 0.0  ;;  %v1615_v39 = vmax.f32 %v1551_v62, 0.0  ;;  %v3249_v17 = vmul.f32 %v3207_v51, %v2902_v22 }
 0x1c5   :  { %v3253_v42 = vmul.f32 %v3207_v51, %v2907_v7  ;;  %v3257_v52 = vmul.f32 %v3207_v51, %v2916_v9  ;;  %v1501_v18 = vmul.f32 %v3207_v51, %v2934_v21  ;;  %v3263_v44 = vmul.f32 %v3207_v51, %v2940_v28 }
 0x1c6   :  { %v1507_v50 = vmul.f32 %v3207_v51, %v2974_v58  ;;  %1775 = vxpose.xlu2.b32.start [1/16] %v1647_v4, 128  ;;  %1711 = vxpose.xlu1.b32.start [1/16] %v1631_v10, 128  ;;  %v1508_v22 = vmul.f32 %v3207_v51, %v2980_v32  ;;  %v1509_v7 = vmul.f32 %v3207_v51, %v2986_v35  ;;  %v3782_v10 = vld [vmem:[#allocation26_spill] sm:$0xff] }
 0x1c7   :  { %v1510_v9 = vmul.f32 %v3207_v51, %v2994_v6  ;;  %v1511_v21 = vmul.f32 %v3207_v51, %v3000_v36  ;;  %1679 = vxpose.xlu0.b32.start [1/16] %v1615_v39, 128  ;;  %v1512_v28 = vmul.f32 %v3207_v51, %v3006_v41  ;;  %v1584_v58 = vadd.f32 %v3212_v24, %v1516_v63 }
 0x1c8   :  { %v1568_v40 = vadd.f32 %v3212_v24, %v1500_v8  ;;  %v1552_v25 = vadd.f32 %v3212_v24, %v1484_v54  ;;  %v1513_v32 = vmul.f32 %v3207_v51, %v3012_v37  ;;  %v1514_v35 = vmul.f32 %v3207_v51, %v3018_v49 }
 0x1c9   :  { %v1523_v6 = vmul.f32 %v3207_v51, %v3072_v48  ;;  %v1524_v36 = vmul.f32 %v3207_v51, %v3078_v43  ;;  %v1517_v41 = vmul.f32 %v3207_v51, %v3038_v57  ;;  %v1518_v47 = vmul.f32 %v3207_v51, %v2825_v56 }
 0x1ca   :  { %v1525_v46 = vmul.f32 %v3207_v51, %v3083_v60  ;;  %v1526_v37 = vmul.f32 %v3207_v51, %v3088_v38  ;;  %v1527_v49 = vmul.f32 %v3207_v51, %v3093_v14  ;;  %v1528_v48 = vmul.f32 %v3207_v51, %v3100_v33 }
 0x1cb   :  { %v1529_v43 = vmul.f32 %v3207_v51, %v3105_v12  ;;  %v1530_v57 = vmul.f32 %v3207_v51, %v3109_v30  ;;  %v1531_v56 = vmul.f32 %v3207_v51, %v3115_v19  ;;  %v1648_v23 = vmax.f32 %v1584_v58, 0.0 }
 0x1cc   :  { %v1632_v60 = vmax.f32 %v1568_v40, 0.0  ;;  %v1616_v15 = vmax.f32 %v1552_v25, 0.0  ;;  %v3307_v38 = vadd.f32 %v3212_v24, %v1523_v6  ;;  %v3310_v14 = vadd.f32 %v3212_v24, %v1507_v50  ;;  %v3784_v50 = vld [vmem:[#allocation28_spill] sm:$0xff] }
 0x1cd   :  { %v3313_v33 = vadd.f32 %v3212_v24, %v1491_v34  ;;  %v3316_v12 = vadd.f32 %v3212_v24, %v1524_v36  ;;  %v3319_v30 = vadd.f32 %v3212_v24, %v1508_v22  ;;  %v3322_v19 = vadd.f32 %v3212_v24, %v1492_v3 }
 0x1ce   :  { %1776 = vxpose.xlu2.b32.cont [2/16] %v1648_v23, 128  ;;  %1712 = vxpose.xlu1.b32.cont [2/16] %v1632_v60, 128  ;;  %v3325_v13 = vadd.f32 %v3212_v24, %v1525_v46  ;;  %v1532_v53 = vmul.f32 %v3207_v51, %v3121_v0  ;;  %v1533_v20 = vmul.f32 %v3207_v51, %v3127_v2 }
 0x1cf   :  { %v1534_v54 = vmul.f32 %v3207_v51, %v3133_v29  ;;  %v1535_v34 = vmul.f32 %v3207_v51, %v2830_v59  ;;  %1680 = vxpose.xlu0.b32.cont [2/16] %v1616_v15, 128  ;;  %v1585_v27 = vadd.f32 %v3212_v24, %v1517_v41  ;;  %v1569_v16 = vadd.f32 %v3212_v24, %v1501_v18  ;;  %v3786_v41 = vld [vmem:[#allocation30_spill] sm:$0xff] }
 0x1d0   :  { %v1553_v62 = vadd.f32 %v3212_v24, %v3224_v31  ;;  %v3340_v3 = vadd.f32 %v3212_v24, %v1509_v7  ;;  %v3343_v0 = vadd.f32 %v3212_v24, %v1493_v26  ;;  %v3346_v2 = vadd.f32 %v3212_v24, %v1526_v37 }
 0x1d1   :  { %v3349_v29 = vadd.f32 %v3212_v24, %v1510_v9  ;;  %v3352_v59 = vadd.f32 %v3212_v24, %v1494_v5  ;;  %v1536_v8 = vmul.f32 %v3207_v51, %v3141_v45  ;;  %v3357_v31 = vadd.f32 %v3212_v24, %v1527_v49  ;;  %v3783_v5 = vld [vmem:[#allocation27_spill] sm:$0xff]  ;;  %v3788_v49 = vld [vmem:[#allocation32_spill] sm:$0xff] }
 0x1d2   :  { %v3360_v63 = vadd.f32 %v3212_v24, %v1511_v21  ;;  %v3363_v26 = vadd.f32 %v3212_v24, %v1495_v11  ;;  %v1537_v4 = vmul.f32 %v3207_v51, %v3147_v55  ;;  %v1538_v39 = vmul.f32 %v3207_v51, %v3782_v10  ;;  %v3792_v10 = vld [vmem:[#allocation22_spill] sm:$0xff] }
 0x1d3   :  { %v1539_v18 = vmul.f32 %v3207_v51, %v3783_v5  ;;  %v1540_v45 = vmul.f32 %v3207_v51, %v3784_v50  ;;  %v1649_v22 = vmax.f32 %v1585_v27, 0.0  ;;  %v1633_v7 = vmax.f32 %v1569_v16, 0.0 }
 0x1d4   :  { %v1617_v9 = vmax.f32 %v1553_v62, 0.0  ;;  %v3374_v21 = vadd.f32 %v3212_v24, %v1528_v48  ;;  %v3377_v11 = vadd.f32 %v3212_v24, %v1512_v28  ;;  %v3381_v55 = vadd.f32 %v3212_v24, %v3249_v17  ;;  %v3785_v17 = vld [vmem:[#allocation29_spill] sm:$0xff] }
 0x1d5   :  { %v3384_v58 = vadd.f32 %v3212_v24, %v1529_v43  ;;  %v3387_v40 = vadd.f32 %v3212_v24, %v1513_v32  ;;  %v3391_v25 = vadd.f32 %v3212_v24, %v3253_v42  ;;  %v3394_v6 = vadd.f32 %v3212_v24, %v1530_v57  ;;  %v3787_v32 = vld [vmem:[#allocation31_spill] sm:$0xff] }
 0x1d6   :  { %1777 = vxpose.xlu2.b32.cont [3/16] %v1649_v22, 128  ;;  %1713 = vxpose.xlu1.b32.cont [3/16] %v1633_v7, 128  ;;  %v3397_v28 = vadd.f32 %v3212_v24, %v1514_v35  ;;  %v1541_v36 = vmul.f32 %v3207_v51, %v3785_v17  ;;  %v1542_v46 = vmul.f32 %v3207_v51, %v3786_v41 }
 0x1d7   :  { %v1543_v37 = vmul.f32 %v3207_v51, %v3787_v32  ;;  %v1544_v48 = vmul.f32 %v3207_v51, %v3788_v49  ;;  %1681 = vxpose.xlu0.b32.cont [3/16] %v1617_v9, 128  ;;  %v1586_v42 = vadd.f32 %v3212_v24, %v1518_v47  ;;  %v1570_v43 = vadd.f32 %v3212_v24, %v3263_v44  ;;  %v3789_v44 = vld [vmem:[#allocation33_spill] sm:$0xff]  ;;  %v3793_v32 = vld [vmem:[#allocation19_spill] sm:$0xff] }
 0x1d8   :  { %v1554_v35 = vadd.f32 %v3212_v24, %v3228_v61  ;;  %v3414_v57 = vadd.f32 %v3212_v24, %v3257_v52  ;;  %v3417_v23 = vadd.f32 %v3212_v24, %v1531_v56  ;;  %v3420_v60 = vadd.f32 %v3212_v24, %v1532_v53  ;;  %v3794_v49 = vld [vmem:[#allocation23_spill] sm:$0xff] }
 0x1d9   :  { %v3423_v15 = vadd.f32 %v3212_v24, %v1533_v20  ;;  %v3426_v47 = vadd.f32 %v3212_v24, %v1534_v54  ;;  %v1545_v27 = vmul.f32 %v3207_v51, %v3789_v44  ;;  %v3431_v61 = vadd.f32 %v3212_v24, %v1535_v34  ;;  %v3790_v20 = vld [vmem:[#allocation14_spill] sm:$0xff] }
 0x1da   :  { %v3434_v52 = vadd.f32 %v3212_v24, %v1536_v8  ;;  %v3437_v56 = vadd.f32 %v3212_v24, %v1537_v4  ;;  %v1546_v53 = vmul.f32 %v3207_v51, %v3198_v1  ;;  %v1487_v16 = vmul.f32 %v3207_v51, %v3790_v20  ;;  %v3791_v54 = vld [vmem:[#allocation18_spill] sm:$0xff] }
 0x1db   :  { %v1503_v62 = vmul.f32 %v3207_v51, %v3791_v54  ;;  %v1519_v5 = vmul.f32 %v3207_v51, %v3792_v10  ;;  %v1650_v34 = vmax.f32 %v1586_v42, 0.0  ;;  %v1634_v50 = vmax.f32 %v1570_v43, 0.0  ;;  %v3796_v54 = vld [vmem:[#allocation20_spill] sm:$0xff] }
 0x1dc   :  { %v1618_v22 = vmax.f32 %v1554_v35, 0.0  ;;  %v3448_v8 = vadd.f32 %v3212_v24, %v1538_v39  ;;  %v3451_v4 = vadd.f32 %v3212_v24, %v1539_v18  ;;  %v3454_v1 = vadd.f32 %v3212_v24, %v1540_v45  ;;  %v3795_v35 = vld [vmem:[#allocation15_spill] sm:$0xff]  ;;  %v3797_v10 = vld [vmem:[#allocation24_spill] sm:$0xff] }
 0x1dd   :  { %v3457_v7 = vadd.f32 %v3212_v24, %v1541_v36  ;;  %v3460_v9 = vadd.f32 %v3212_v24, %v1542_v46  ;;  %v3463_v17 = vadd.f32 %v3212_v24, %v1543_v37  ;;  %v3466_v39 = vadd.f32 %v3212_v24, %v1544_v48 }
 0x1de   :  { %1778 = vxpose.xlu2.b32.cont [4/16] %v1650_v34, 128  ;;  %1714 = vxpose.xlu1.b32.cont [4/16] %v1634_v50, 128  ;;  %v3469_v18 = vadd.f32 %v3212_v24, %v1545_v27  ;;  %v1587_v45 = vadd.f32 %v3212_v24, %v1519_v5  ;;  %v1571_v36 = vadd.f32 %v3212_v24, %v1503_v62 }
 0x1df   :  { %1682 = vxpose.xlu0.b32.cont [4/16] %v1618_v22, 128  ;;  %v3474_v41 = vadd.f32 %v3212_v24, %v1546_v53  ;;  %v1555_v46 = vadd.f32 %v3212_v24, %v1487_v16  ;;  %v1504_v37 = vmul.f32 %v3207_v51, %v3793_v32  ;;  %v1520_v48 = vmul.f32 %v3207_v51, %v3794_v49  ;;  %v3798_v22 = vld [vmem:[#allocation16_spill] sm:$0xff]  ;;  %v3799_v49 = vld [vmem:[#allocation21_spill] sm:$0xff] }
 0x1e0   :  { %v1651_v42 = vmax.f32 %v1587_v45, 0.0  ;;  %v1635_v43 = vmax.f32 %v1571_v36, 0.0  ;;  %v1488_v44 = vmul.f32 %v3207_v51, %v3795_v35  ;;  %v1505_v62 = vmul.f32 %v3207_v51, %v3796_v54 }
 0x1e1   :  { %v1619_v27 = vmax.f32 %v1555_v46, 0.0  ;;  %v1588_v53 = vadd.f32 %v3212_v24, %v1520_v48  ;;  %v1572_v20 = vadd.f32 %v3212_v24, %v1504_v37  ;;  %v1521_v5 = vmul.f32 %v3207_v51, %v3797_v10 }
 0x1e2   :  { %v1556_v16 = vadd.f32 %v3212_v24, %v1488_v44  ;;  %v1489_v45 = vmul.f32 %v3207_v51, %v3798_v22  ;;  %v1573_v32 = vadd.f32 %v3212_v24, %v1505_v62  ;;  %v1506_v48 = vmul.f32 %v3207_v51, %v3799_v49 }
 0x1e3   :  { %v1652_v34 = vmax.f32 %v1588_v53, 0.0  ;;  %v1636_v50 = vmax.f32 %v1572_v20, 0.0  ;;  %v1589_v46 = vadd.f32 %v3212_v24, %v1521_v5  ;;  %v1623_v22 = vmax.f32 %v3313_v33, 0.0 }
 0x1e4   :  { %v1620_v36 = vmax.f32 %v1556_v16, 0.0  ;;  %v1557_v37 = vadd.f32 %v3212_v24, %v1489_v45  ;;  %v1637_v44 = vmax.f32 %v1573_v32, 0.0  ;;  %v1574_v54 = vadd.f32 %v3212_v24, %v1506_v48 }
 0x1e5   :  { %v1653_v35 = vmax.f32 %v1589_v46, 0.0  ;;  %v1656_v45 = vmax.f32 %v3316_v12, 0.0  ;;  %v1657_v46 = vmax.f32 %v3325_v13, 0.0  ;;  %v1658_v33 = vmax.f32 %v3346_v2, 0.0 }
 0x1e6   :  { %1779 = vxpose.xlu2.b32.cont [5/16] %v1651_v42, 128  ;;  %1715 = vxpose.xlu1.b32.cont [5/16] %v1635_v43, 128  ;;  %v3800_v42 = vld [vmem:[#allocation25_spill] sm:$0xff]  ;;  %v1621_v20 = vmax.f32 %v1557_v37, 0.0  ;;  %v1638_v5 = vmax.f32 %v1574_v54, 0.0  ;;  %v1642_v12 = vmax.f32 %v3349_v29, 0.0  ;;  %v1643_v13 = vmax.f32 %v3360_v63, 0.0 }
 0x1e7   :  { %1683 = vxpose.xlu0.b32.cont [5/16] %v1619_v27, 128  ;;  %v1522_v43 = vmul.f32 %v3207_v51, %v3800_v42  ;;  %v3801_v27 = vld [vmem:[#allocation17_spill] sm:$0xff]  ;;  %v1644_v2 = vmax.f32 %v3377_v11, 0.0  ;;  %v1628_v29 = vmax.f32 %v3381_v55, 0.0  ;;  %v1629_v63 = vmax.f32 %v3391_v25, 0.0 }
 0x1e8   :  { %v1490_v53 = vmul.f32 %v3207_v51, %v3801_v27  ;;  %v1639_v51 = vmax.f32 %v3310_v14, 0.0  ;;  %v1625_v14 = vmax.f32 %v3343_v0, 0.0  ;;  %v1660_v0 = vmax.f32 %v3374_v21, 0.0 }
 0x1e9   :  { %v1590_v16 = vadd.f32 %v3212_v24, %v1522_v43  ;;  %v1646_v21 = vmax.f32 %v3397_v28, 0.0  ;;  %v1630_v11 = vmax.f32 %v3414_v57, 0.0  ;;  %v1663_v55 = vmax.f32 %v3417_v23, 0.0 }
 0x1ea   :  { %v1558_v62 = vadd.f32 %v3212_v24, %v1490_v53  ;;  %v1624_v24 = vmax.f32 %v3322_v19, 0.0  ;;  %v1659_v19 = vmax.f32 %v3357_v31, 0.0  ;;  %v1645_v31 = vmax.f32 %v3387_v40, 0.0 }
 0x1eb   :  { %v1654_v10 = vmax.f32 %v1590_v16, 0.0  ;;  %v1665_v40 = vmax.f32 %v3423_v15, 0.0  ;;  %v1666_v25 = vmax.f32 %v3426_v47, 0.0  ;;  %v1668_v57 = vmax.f32 %v3434_v52, 0.0 }
 0x1ec   :  { %v1670_v47 = vmax.f32 %v3448_v8, 0.0  ;;  %v1671_v52 = vmax.f32 %v3451_v4, 0.0  ;;  %v1673_v8 = vmax.f32 %v3457_v7, 0.0  ;;  %v1674_v4 = vmax.f32 %v3460_v9, 0.0 }
 0x1ed   :  { %v1676_v7 = vmax.f32 %v3466_v39, 0.0  ;;  %v1677_v9 = vmax.f32 %v3469_v18, 0.0 }
 0x1ee   :  { %1780 = vxpose.xlu2.b32.cont [6/16] %v1652_v34, 128  ;;  %1716 = vxpose.xlu1.b32.cont [6/16] %v1636_v50, 128  ;;  %v1622_v34 = vmax.f32 %v1558_v62, 0.0  ;;  %v1655_v50 = vmax.f32 %v3307_v38, 0.0  ;;  %v1641_v38 = vmax.f32 %v3340_v3, 0.0  ;;  %v1627_v3 = vmax.f32 %v3363_v26, 0.0 }
 0x1ef   :  { %1684 = vxpose.xlu0.b32.cont [6/16] %v1620_v36, 128  ;;  %v1640_v36 = vmax.f32 %v3319_v30, 0.0  ;;  %v1626_v30 = vmax.f32 %v3352_v59, 0.0  ;;  %v1661_v59 = vmax.f32 %v3384_v58, 0.0  ;;  %v1662_v26 = vmax.f32 %v3394_v6, 0.0 }
 0x1f0   :  { %v1664_v58 = vmax.f32 %v3420_v60, 0.0  ;;  %v1667_v6 = vmax.f32 %v3431_v61, 0.0  ;;  %v1669_v60 = vmax.f32 %v3437_v56, 0.0  ;;  %v1672_v56 = vmax.f32 %v3454_v1, 0.0 }
 0x1f1   :  { %v1675_v1 = vmax.f32 %v3463_v17, 0.0  ;;  %v1678_v17 = vmax.f32 %v3474_v41, 0.0 }
 0x1f6   :  { %1781 = vxpose.xlu2.b32.cont [7/16] %v1653_v35, 128  ;;  %1717 = vxpose.xlu1.b32.cont [7/16] %v1637_v44, 128 }
 0x1f7   :  { %1685 = vxpose.xlu0.b32.cont [7/16] %v1621_v20, 128 }
 0x1fe   :  { %1782 = vxpose.xlu2.b32.cont [8/16] %v1654_v10, 128  ;;  %1718 = vxpose.xlu1.b32.cont [8/16] %v1638_v5, 128 }
 0x1ff   :  { %1686 = vxpose.xlu0.b32.cont [8/16] %v1622_v34, 128 }
 0x206   :  { %1783 = vxpose.xlu2.b32.cont [9/16] %v1655_v50, 128  ;;  %1719 = vxpose.xlu1.b32.cont [9/16] %v1639_v51, 128 }
 0x207   :  { %1687 = vxpose.xlu0.b32.cont [9/16] %v1623_v22, 128 }
 0x20e   :  { %1784 = vxpose.xlu2.b32.cont [10/16] %v1656_v45, 128  ;;  %1720 = vxpose.xlu1.b32.cont [10/16] %v1640_v36, 128 }
 0x20f   :  { %1688 = vxpose.xlu0.b32.cont [10/16] %v1624_v24, 128 }
 0x216   :  { %1785 = vxpose.xlu2.b32.cont [11/16] %v1657_v46, 128  ;;  %1721 = vxpose.xlu1.b32.cont [11/16] %v1641_v38, 128 }
 0x217   :  { %1689 = vxpose.xlu0.b32.cont [11/16] %v1625_v14, 128 }
 0x21e   :  { %1786 = vxpose.xlu2.b32.cont [12/16] %v1658_v33, 128  ;;  %1722 = vxpose.xlu1.b32.cont [12/16] %v1642_v12, 128 }
 0x21f   :  { %1690 = vxpose.xlu0.b32.cont [12/16] %v1626_v30, 128 }
 0x226   :  { %1787 = vxpose.xlu2.b32.cont [13/16] %v1659_v19, 128  ;;  %1723 = vxpose.xlu1.b32.cont [13/16] %v1643_v13, 128 }
 0x227   :  { %1691 = vxpose.xlu0.b32.cont [13/16] %v1627_v3, 128 }
 0x22e   :  { %1788 = vxpose.xlu2.b32.cont [14/16] %v1660_v0, 128  ;;  %1724 = vxpose.xlu1.b32.cont [14/16] %v1644_v2, 128 }
 0x22f   :  { %1692 = vxpose.xlu0.b32.cont [14/16] %v1628_v29, 128 }
 0x236   :  { %1789 = vxpose.xlu2.b32.cont [15/16] %v1661_v59, 128  ;;  %1725 = vxpose.xlu1.b32.cont [15/16] %v1645_v31, 128 }
 0x237   :  { %1693 = vxpose.xlu0.b32.cont [15/16] %v1629_v63, 128 }
 0x23e   :  { %1790 = vxpose.xlu2.b32.end [16/16] %v1662_v26, 128  ;;  %1726 = vxpose.xlu1.b32.end [16/16] %v1646_v21, 128 }
 0x23f   :  { %1694 = vxpose.xlu0.b32.end [16/16] %v1630_v11, 128 }
 0x247   :  { %1807 = vxpose.xlu0.b32.start [1/16] %v1663_v55, 128 }
 0x24f   :  { %1808 = vxpose.xlu0.b32.cont [2/16] %v1664_v58, 128 }
 0x257   :  { %1809 = vxpose.xlu0.b32.cont [3/16] %v1665_v40, 128 }
 0x25f   :  { %1810 = vxpose.xlu0.b32.cont [4/16] %v1666_v25, 128  ;;  %v1791_v39 = vpop.trf.xlu2 }
 0x260   :  { %1953 = vst [vmem:[%s3741_s5 + $0x100] sm:$0xff] %v1791_v39 }
 0x267   :  { %1811 = vxpose.xlu0.b32.cont [5/16] %v1667_v6, 128  ;;  %v1792_v41 = vpop.trf.xlu2 }
 0x268   :  { %1955 = vst [vmem:[%s3741_s5 + $0x110] sm:$0xff] %v1792_v41 }
 0x26a   :  { %v1727_v27 = vpop.trf.xlu1 }
 0x26b   :  { %v1695_v28 = vpop.trf.xlu0  ;;  %1744 = vst [vmem:[%s3741_s5 + $0x8] sm:$0xff] %v1727_v27 }
 0x26c   :  { %1743 = vst [vmem:[%s3741_s5] sm:$0xff] %v1695_v28 }
 0x26f   :  { %1812 = vxpose.xlu0.b32.cont [6/16] %v1668_v57, 128  ;;  %v1793_v16 = vpop.trf.xlu2 }
 0x270   :  { %1957 = vst [vmem:[%s3741_s5 + $0x120] sm:$0xff] %v1793_v16 }
 0x272   :  { %v1728_v53 = vpop.trf.xlu1 }
 0x273   :  { %v1696_v23 = vpop.trf.xlu0  ;;  %1746 = vst [vmem:[%s3741_s5 + $0x18] sm:$0xff] %v1728_v53 }
 0x274   :  { %1745 = vst [vmem:[%s3741_s5 + $0x10] sm:$0xff] %v1696_v23 }
 0x277   :  { %1813 = vxpose.xlu0.b32.cont [7/16] %v1669_v60, 128  ;;  %v1794_v10 = vpop.trf.xlu2 }
 0x278   :  { %1959 = vst [vmem:[%s3741_s5 + $0x130] sm:$0xff] %v1794_v10 }
 0x27a   :  { %v1729_v54 = vpop.trf.xlu1 }
 0x27b   :  { %v1697_v15 = vpop.trf.xlu0  ;;  %1748 = vst [vmem:[%s3741_s5 + $0x28] sm:$0xff] %v1729_v54 }
 0x27c   :  { %1747 = vst [vmem:[%s3741_s5 + $0x20] sm:$0xff] %v1697_v15 }
 0x27f   :  { %1814 = vxpose.xlu0.b32.cont [8/16] %v1670_v47, 128  ;;  %v1795_v50 = vpop.trf.xlu2 }
 0x280   :  { %1961 = vst [vmem:[%s3741_s5 + $0x140] sm:$0xff] %v1795_v50 }
 0x282   :  { %v1730_v5 = vpop.trf.xlu1 }
 0x283   :  { %v1698_v61 = vpop.trf.xlu0  ;;  %1750 = vst [vmem:[%s3741_s5 + $0x38] sm:$0xff] %v1730_v5 }
 0x284   :  { %1749 = vst [vmem:[%s3741_s5 + $0x30] sm:$0xff] %v1698_v61 }
 0x287   :  { %1815 = vxpose.xlu0.b32.cont [9/16] %v1671_v52, 128  ;;  %v1796_v45 = vpop.trf.xlu2 }
 0x288   :  { %1963 = vst [vmem:[%s3741_s5 + $0x150] sm:$0xff] %v1796_v45 }
 0x28a   :  { %v1731_v51 = vpop.trf.xlu1 }
 0x28b   :  { %v1699_v32 = vpop.trf.xlu0  ;;  %1752 = vst [vmem:[%s3741_s5 + $0x48] sm:$0xff] %v1731_v51 }
 0x28c   :  { %1751 = vst [vmem:[%s3741_s5 + $0x40] sm:$0xff] %v1699_v32 }
 0x28f   :  { %1816 = vxpose.xlu0.b32.cont [10/16] %v1672_v56, 128  ;;  %v1797_v46 = vpop.trf.xlu2 }
 0x290   :  { %1965 = vst [vmem:[%s3741_s5 + $0x160] sm:$0xff] %v1797_v46 }
 0x292   :  { %v1732_v36 = vpop.trf.xlu1 }
 0x293   :  { %v1700_v37 = vpop.trf.xlu0  ;;  %1754 = vst [vmem:[%s3741_s5 + $0x58] sm:$0xff] %v1732_v36 }
 0x294   :  { %1753 = vst [vmem:[%s3741_s5 + $0x50] sm:$0xff] %v1700_v37 }
 0x297   :  { %1817 = vxpose.xlu0.b32.cont [11/16] %v1673_v8, 128  ;;  %v1798_v33 = vpop.trf.xlu2 }
 0x298   :  { %1967 = vst [vmem:[%s3741_s5 + $0x170] sm:$0xff] %v1798_v33 }
 0x29a   :  { %v1733_v38 = vpop.trf.xlu1 }
 0x29b   :  { %v1701_v49 = vpop.trf.xlu0  ;;  %1756 = vst [vmem:[%s3741_s5 + $0x68] sm:$0xff] %v1733_v38 }
 0x29c   :  { %1755 = vst [vmem:[%s3741_s5 + $0x60] sm:$0xff] %v1701_v49 }
 0x29f   :  { %1818 = vxpose.xlu0.b32.cont [12/16] %v1674_v4, 128  ;;  %v1799_v19 = vpop.trf.xlu2 }
 0x2a0   :  { %1969 = vst [vmem:[%s3741_s5 + $0x180] sm:$0xff] %v1799_v19 }
 0x2a2   :  { %v1734_v12 = vpop.trf.xlu1 }
 0x2a3   :  { %v1702_v48 = vpop.trf.xlu0  ;;  %1758 = vst [vmem:[%s3741_s5 + $0x78] sm:$0xff] %v1734_v12 }
 0x2a4   :  { %1757 = vst [vmem:[%s3741_s5 + $0x70] sm:$0xff] %v1702_v48 }
 0x2a7   :  { %1819 = vxpose.xlu0.b32.cont [13/16] %v1675_v1, 128  ;;  %v1800_v0 = vpop.trf.xlu2 }
 0x2a8   :  { %1971 = vst [vmem:[%s3741_s5 + $0x190] sm:$0xff] %v1800_v0 }
 0x2aa   :  { %v1735_v13 = vpop.trf.xlu1 }
 0x2ab   :  { %v1703_v42 = vpop.trf.xlu0  ;;  %1760 = vst [vmem:[%s3741_s5 + $0x88] sm:$0xff] %v1735_v13 }
 0x2ac   :  { %1759 = vst [vmem:[%s3741_s5 + $0x80] sm:$0xff] %v1703_v42 }
 0x2af   :  { %1820 = vxpose.xlu0.b32.cont [14/16] %v1676_v7, 128  ;;  %v1801_v59 = vpop.trf.xlu2 }
 0x2b0   :  { %1973 = vst [vmem:[%s3741_s5 + $0x1a0] sm:$0xff] %v1801_v59 }
 0x2b2   :  { %v1736_v2 = vpop.trf.xlu1 }
 0x2b3   :  { %v1704_v43 = vpop.trf.xlu0  ;;  %1762 = vst [vmem:[%s3741_s5 + $0x98] sm:$0xff] %v1736_v2 }
 0x2b4   :  { %1761 = vst [vmem:[%s3741_s5 + $0x90] sm:$0xff] %v1704_v43 }
 0x2b7   :  { %1821 = vxpose.xlu0.b32.cont [15/16] %v1677_v9, 128  ;;  %v1802_v26 = vpop.trf.xlu2 }
 0x2b8   :  { %1975 = vst [vmem:[%s3741_s5 + $0x1b0] sm:$0xff] %v1802_v26 }
 0x2ba   :  { %v1737_v31 = vpop.trf.xlu1 }
 0x2bb   :  { %v1705_v35 = vpop.trf.xlu0  ;;  %1764 = vst [vmem:[%s3741_s5 + $0xa8] sm:$0xff] %v1737_v31 }
 0x2bc   :  { %1763 = vst [vmem:[%s3741_s5 + $0xa0] sm:$0xff] %v1705_v35 }
 0x2bf   :  { %1822 = vxpose.xlu0.b32.end [16/16] %v1678_v17, 128  ;;  %v1803_v55 = vpop.trf.xlu2 }
 0x2c0   :  { %1977 = vst [vmem:[%s3741_s5 + $0x1c0] sm:$0xff] %v1803_v55 }
 0x2c2   :  { %v1738_v21 = vpop.trf.xlu1 }
 0x2c3   :  { %v1706_v44 = vpop.trf.xlu0  ;;  %1766 = vst [vmem:[%s3741_s5 + $0xb8] sm:$0xff] %v1738_v21 }
 0x2c4   :  { %1765 = vst [vmem:[%s3741_s5 + $0xb0] sm:$0xff] %v1706_v44 }
 0x2c7   :  { %v1804_v25 = vpop.trf.xlu2 }
 0x2c8   :  { %1979 = vst [vmem:[%s3741_s5 + $0x1d0] sm:$0xff] %v1804_v25 }
 0x2ca   :  { %v1739_v58 = vpop.trf.xlu1 }
 0x2cb   :  { %v1707_v18 = vpop.trf.xlu0  ;;  %1768 = vst [vmem:[%s3741_s5 + $0xc8] sm:$0xff] %v1739_v58 }
 0x2cc   :  { %1767 = vst [vmem:[%s3741_s5 + $0xc0] sm:$0xff] %v1707_v18 }
 0x2cf   :  { %v1805_v57 = vpop.trf.xlu2 }
 0x2d0   :  { %1981 = vst [vmem:[%s3741_s5 + $0x1e0] sm:$0xff] %v1805_v57 }
 0x2d2   :  { %v1740_v6 = vpop.trf.xlu1 }
 0x2d3   :  { %v1708_v20 = vpop.trf.xlu0  ;;  %1770 = vst [vmem:[%s3741_s5 + $0xd8] sm:$0xff] %v1740_v6 }
 0x2d4   :  { %1769 = vst [vmem:[%s3741_s5 + $0xd0] sm:$0xff] %v1708_v20 }
 0x2d7   :  { %v1806_v15 = vpop.trf.xlu2 }
 0x2d8   :  { %1983 = vst [vmem:[%s3741_s5 + $0x1f0] sm:$0xff] %v1806_v15 }
 0x2da   :  { %v1741_v23 = vpop.trf.xlu1 }
 0x2db   :  { %v1709_v62 = vpop.trf.xlu0  ;;  %1772 = vst [vmem:[%s3741_s5 + $0xe8] sm:$0xff] %v1741_v23 }
 0x2dc   :  { %1771 = vst [vmem:[%s3741_s5 + $0xe0] sm:$0xff] %v1709_v62 }
 0x2e2   :  { %v1742_v47 = vpop.trf.xlu1 }
 0x2e3   :  { %v1710_v34 = vpop.trf.xlu0  ;;  %1774 = vst [vmem:[%s3741_s5 + $0xf8] sm:$0xff] %v1742_v47 }
 0x2e4   :  { %1773 = vst [vmem:[%s3741_s5 + $0xf0] sm:$0xff] %v1710_v34 }
 0x2eb   :  { %v1823_v22 = vpop.trf.xlu0 }
 0x2ec   :  { %1954 = vst [vmem:[%s3741_s5 + $0x108] sm:$0xff] %v1823_v22 }
 0x2f3   :  { %v1824_v24 = vpop.trf.xlu0 }
 0x2f4   :  { %1956 = vst [vmem:[%s3741_s5 + $0x118] sm:$0xff] %v1824_v24 }
 0x2fb   :  { %v1825_v14 = vpop.trf.xlu0 }
 0x2fc   :  { %1958 = vst [vmem:[%s3741_s5 + $0x128] sm:$0xff] %v1825_v14 }
 0x303   :  { %v1826_v30 = vpop.trf.xlu0 }
 0x304   :  { %1960 = vst [vmem:[%s3741_s5 + $0x138] sm:$0xff] %v1826_v30 }
 0x30b   :  { %v1827_v3 = vpop.trf.xlu0 }
 0x30c   :  { %1962 = vst [vmem:[%s3741_s5 + $0x148] sm:$0xff] %v1827_v3 }
 0x313   :  { %v1828_v29 = vpop.trf.xlu0 }
 0x314   :  { %1964 = vst [vmem:[%s3741_s5 + $0x158] sm:$0xff] %v1828_v29 }
 0x31b   :  { %v1829_v63 = vpop.trf.xlu0 }
 0x31c   :  { %1966 = vst [vmem:[%s3741_s5 + $0x168] sm:$0xff] %v1829_v63 }
 0x323   :  { %v1830_v11 = vpop.trf.xlu0 }
 0x324   :  { %1968 = vst [vmem:[%s3741_s5 + $0x178] sm:$0xff] %v1830_v11 }
 0x32b   :  { %v1831_v40 = vpop.trf.xlu0 }
 0x32c   :  { %1970 = vst [vmem:[%s3741_s5 + $0x188] sm:$0xff] %v1831_v40 }
 0x333   :  { %v1832_v28 = vpop.trf.xlu0 }
 0x334   :  { %1972 = vst [vmem:[%s3741_s5 + $0x198] sm:$0xff] %v1832_v28 }
 0x33b   :  { %v1833_v60 = vpop.trf.xlu0 }
 0x33c   :  { %1974 = vst [vmem:[%s3741_s5 + $0x1a8] sm:$0xff] %v1833_v60 }
 0x343   :  { %v1834_v61 = vpop.trf.xlu0 }
 0x344   :  { %1976 = vst [vmem:[%s3741_s5 + $0x1b8] sm:$0xff] %v1834_v61 }
 0x34b   :  { %v1835_v52 = vpop.trf.xlu0 }
 0x34c   :  { %1978 = vst [vmem:[%s3741_s5 + $0x1c8] sm:$0xff] %v1835_v52 }
 0x353   :  { %v1836_v32 = vpop.trf.xlu0 }
 0x354   :  { %1980 = vst [vmem:[%s3741_s5 + $0x1d8] sm:$0xff] %v1836_v32 }
 0x35b   :  { %v1837_v56 = vpop.trf.xlu0 }
 0x35c   :  { %1982 = vst [vmem:[%s3741_s5 + $0x1e8] sm:$0xff] %v1837_v56 }
 0x363   :  { %v1838_v37 = vpop.trf.xlu0 }
 0x364   :  { %1984 = vst [vmem:[%s3741_s5 + $0x1f8] sm:$0xff] %v1838_v37 }

</bundles_post_ra>
